<compile_context>
chip_gen: v6e
topology: v6e:2x2x1
jax: 0.10.0
libtpu: 0.0.40
codegen_flags: <defaults>
</compile_context>

<pallas_src>
import functools
import math

import jax
import jax.numpy as jnp
import numpy as np
from jax.experimental import pallas as pl
from jax.experimental.pallas import tpu as pltpu


def _round_up(n, m):
    return ((n + m - 1) // m) * m


def _layer_norm(v, g, b, eps=1e-5):
    mu = jnp.mean(v, axis=-1, keepdims=True)
    var = jnp.mean((v - mu) ** 2, axis=-1, keepdims=True)
    return (v - mu) * jax.lax.rsqrt(var + eps) * g + b


def _gelu(x):
    # tanh-approximate GELU (kept in f32 inside the kernel)
    c = math.sqrt(2.0 / math.pi)
    return 0.5 * x * (1.0 + jnp.tanh(c * (x + 0.044715 * x * x * x)))


def _vmem_limit_bytes():
    """Generation-aware VMEM budget: ~60% of physical VMEM, capped at 48 MiB.

    v5e/v6e (128 MiB physical) -> 48 MiB; v7x (64 MiB physical) -> ~38 MiB.
    """
    cap = 128 * 1024 * 1024
    try:
        cap = int(pltpu.get_tpu_info().vmem_capacity_bytes)
    except Exception:
        pass
    return max(16 * 1024 * 1024, min(48 * 1024 * 1024, (cap * 3) // 5))


def _pick_batch_tile(batch, max_tile=8):
    """Largest divisor of `batch` that is <= max_tile (amortizes weight DMA)."""
    for t in range(min(batch, max_tile), 0, -1):
        if batch % t == 0:
            return t
    return 1


# ----------------------------------------------------------------------------
# Pallas kernel: the FULL transformer stack for one batch tile of Bt sequences.
# grid = (B//Bt, L); the output block (constant index across L) carries the
# resident activations from layer to layer.
# ----------------------------------------------------------------------------
def transformer_stack_kernel(
    x_ref,
    ln1_g_ref, ln1_b_ref,
    w_qkv_ref, b_qkv_ref,
    w_o_ref, b_o_ref,
    ln2_g_ref, ln2_b_ref,
    w_fc1_ref, b_fc1_ref, w_fc2_ref, b_fc2_ref,
    o_ref,
    *, num_heads, seq_len,
):
    l = pl.program_id(1)

    # Layer 0: load the batch-tile activations once; afterwards o_ref (same output
    # block index across the whole L axis) is the resident state for all layers.
    @pl.when(l == 0)
    def _():
        o_ref[...] = x_ref[...]

    Bt, N, D = o_ref.shape
    H = num_heads
    dh = D // H
    M = Bt * N
    scale = 1.0 / math.sqrt(dh)
    bf16 = jnp.bfloat16
    f32 = jnp.float32

    # Flatten (Bt, N, D) -> (Bt*N, D): every projection/MLP matmul is one lane-dense
    # 2-D dot with M = Bt*N rows, so the per-layer weight DMA is amortized over Bt
    # sequences and the MXU sees larger M.
    x = o_ref[...].reshape(M, D)                                       # f32

    # -------- multi-head self-attention (pre-LN) --------
    h = _layer_norm(x, ln1_g_ref[...], ln1_b_ref[...]).astype(bf16)    # (M, D) bf16

    # Fused, lane-dense QKV projection: single (M,D)x(D,3D) matmul, f32 accumulate.
    qkv = jnp.dot(h, w_qkv_ref[...], preferred_element_type=f32) + b_qkv_ref[...]
    q2 = (qkv[:, :D] * scale).astype(bf16)        # fold 1/sqrt(dh) into q
    k2 = qkv[:, D:2 * D].astype(bf16)
    v2 = qkv[:, 2 * D:].astype(bf16)

    # Causal + key-padding mask built in-register (no (N,N) HBM operand); large
    # finite negative instead of -inf avoids inf-inf NaN hazards.
    rowi = jax.lax.broadcasted_iota(jnp.int32, (N, N), 0)
    coli = jax.lax.broadcasted_iota(jnp.int32, (N, N), 1)
    banned = (coli > rowi) | (coli >= seq_len)
    neg = jnp.float32(-1e30)

    # Per-head score/context matmuls (<10% of layer FLOPs) batched over the Bt
    # sequences with a single leading batch dim; heads are a static unrolled loop
    # over lane slices (no in-kernel head transposes).
    ctx_heads = []
    for hi in range(H):
        sl = slice(hi * dh, (hi + 1) * dh)
        qh = q2[:, sl].reshape(Bt, N, dh)
        kh = k2[:, sl].reshape(Bt, N, dh)
        vh = v2[:, sl].reshape(Bt, N, dh)
        s = jnp.einsum("bqd,bkd->bqk", qh, kh,
                       preferred_element_type=f32)                     # (Bt, N, N)
        s = jnp.where(banned[None], neg, s)
        m = jnp.max(s, axis=-1, keepdims=True)
        p = jnp.exp(s - m)                                             # exp in f32
        p = (p * pl.reciprocal(jnp.sum(p, axis=-1, keepdims=True),
                               approx=True)).astype(bf16)              # one cast
        ch = jnp.einsum("bqk,bkd->bqd", p, vh,
                        preferred_element_type=f32)                    # (Bt, N, dh)
        ctx_heads.append(ch.reshape(M, dh))

    # Reassemble heads along lanes and do ONE lane-dense output projection; the head
    # contraction is folded into the D-deep (D,D) matmul (no (H,N,D) f32 pre-sum).
    ctx = jnp.concatenate(ctx_heads, axis=-1).astype(bf16)             # (M, D)
    attn = jnp.dot(ctx, w_o_ref[...], preferred_element_type=f32) + b_o_ref[...]
    x = x + attn

    # -------- MLP (pre-LN) --------
    h2 = _layer_norm(x, ln2_g_ref[...], ln2_b_ref[...]).astype(bf16)
    hid = jnp.dot(h2, w_fc1_ref[...], preferred_element_type=f32) + b_fc1_ref[...]
    hid = _gelu(hid).astype(bf16)
    mlp = jnp.dot(hid, w_fc2_ref[...], preferred_element_type=f32) + b_fc2_ref[...]

    # NOTE: padded query rows (>= seq_len) carry garbage activations but are masked
    # as keys and sliced off by the caller -- keep the key mask above intact.
    o_ref[...] = (x + mlp).reshape(Bt, N, D)


def transformer_stack(x, w, *, num_heads, seq_len):
    """x: (B, N_p, D) f32 padded activations; w: dict of stacked, fused-QKV weights."""
    B, N_p, D = x.shape
    L = w["w_qkv"].shape[0]
    batch_tile = _pick_batch_tile(B)

    names = ["ln1_g", "ln1_b", "w_qkv", "b_qkv", "w_o", "b_o",
             "ln2_g", "ln2_b", "w_fc1", "b_fc1", "w_fc2", "b_fc2"]
    weights = [w[n] for n in names]

    def wspec(a):
        nd = a.ndim
        return pl.BlockSpec((None,) + a.shape[1:],
                            lambda bt, l, _nd=nd: (l,) + (0,) * (_nd - 1))

    act_spec = pl.BlockSpec((batch_tile, N_p, D), lambda bt, l: (bt, 0, 0))

    kernel = functools.partial(transformer_stack_kernel,
                               num_heads=num_heads, seq_len=seq_len)
    return pl.pallas_call(
        kernel,
        out_shape=jax.ShapeDtypeStruct((B, N_p, D), jnp.float32),
        grid=(B // batch_tile, L),
        in_specs=[act_spec] + [wspec(a) for a in weights],
        out_specs=act_spec,
        input_output_aliases={0: 0},   # update the activations in place
        compiler_params=pltpu.CompilerParams(
            dimension_semantics=("parallel", "arbitrary"),
            vmem_limit_bytes=_vmem_limit_bytes(),
        ),
    )(x, *weights)


# ----------------------------------------------------------------------------
# Host-side, one-time repack: fuse Q/K/V into one lane-dense (L, D, 3D) weight and
# (L, 1, 3D) bias so the kernel's QKV projection is a single unmasked-store matmul.
# ----------------------------------------------------------------------------
def _pack_kernel_weights(layers):
    return {
        "ln1_g": layers["ln1_g"], "ln1_b": layers["ln1_b"],
        "w_qkv": jnp.concatenate([layers["w_q"], layers["w_k"], layers["w_v"]], axis=-1),
        "b_qkv": jnp.concatenate([layers["b_q"], layers["b_k"], layers["b_v"]], axis=-1),
        "w_o": layers["w_o"], "b_o": layers["b_o"],
        "ln2_g": layers["ln2_g"], "ln2_b": layers["ln2_b"],
        "w_fc1": layers["w_fc1"], "b_fc1": layers["b_fc1"],
        "w_fc2": layers["w_fc2"], "b_fc2": layers["b_fc2"],
    }


# ----------------------------------------------------------------------------
# TextTransformer forward (embedding glue in JAX, the whole transformer in Pallas).
# ----------------------------------------------------------------------------
def build_causal_attention_mask(seq_len):
    i = jnp.arange(seq_len)[:, None]
    j = jnp.arange(seq_len)[None, :]
    return jnp.where(j > i, -jnp.inf, 0.0).astype(jnp.float32)


def text_transformer_forward(token_ids, params, num_heads):
    B, N = token_ids.shape
    tok = jnp.take(params["token_embedding"], token_ids, axis=0)       # (B, N, D)
    pos = params["position_embedding"][:N][None]                       # (1, N, D)
    x = (tok + pos).astype(jnp.float32)

    # Pad the sequence so score/output tiles are sublane dense (lane dense, i.e.
    # multiples of 128, for realistic sequence lengths such as CLIP's 77).
    N_p = _round_up(N, 128) if N >= 64 else _round_up(N, 8)
    if N_p != N:
        x = jnp.pad(x, ((0, 0), (0, N_p - N), (0, 0)))

    kw = _pack_kernel_weights(params["layers"])
    out = transformer_stack(x, kw, num_heads=num_heads, seq_len=N)
    # ln_final exists in __init__ but TextTransformer.forward does not apply it.
    return out[:, :N, :]


# ----------------------------------------------------------------------------
# Pure-JAX f32 reference (same math, standard head-splitting, separate Q/K/V).
# ----------------------------------------------------------------------------
def _block_ref(x, mask, p, num_heads):
    B, N, D = x.shape
    dh = D // num_heads
    scale = 1.0 / math.sqrt(dh)
    f32 = jnp.float32

    h = _layer_norm(x, p["ln1_g"], p["ln1_b"])
    q = h @ p["w_q"].astype(f32) + p["b_q"]
    k = h @ p["w_k"].astype(f32) + p["b_k"]
    v = h @ p["w_v"].astype(f32) + p["b_v"]

    def split(t):
        return t.reshape(B, N, num_heads, dh).transpose(0, 2, 1, 3)   # (B,H,N,dh)

    qh, kh, vh = split(q), split(k), split(v)
    s = jnp.einsum("bhqd,bhkd->bhqk", qh, kh) * scale + mask[None, None]
    pa = jax.nn.softmax(s, axis=-1)
    o = jnp.einsum("bhqk,bhkd->bhqd", pa, vh).transpose(0, 2, 1, 3).reshape(B, N, D)
    x = x + o @ p["w_o"].astype(f32) + p["b_o"]

    h2 = _layer_norm(x, p["ln2_g"], p["ln2_b"])
    return x + _gelu(h2 @ p["w_fc1"].astype(f32) + p["b_fc1"]) @ p["w_fc2"].astype(f32) \
             + p["b_fc2"]


def forward_ref(token_ids, params, num_heads):
    B, N = token_ids.shape
    x = jnp.take(params["token_embedding"], token_ids, axis=0) + \
        params["position_embedding"][:N][None]
    mask = build_causal_attention_mask(N)
    stacked = params["layers"]
    L = stacked["w_q"].shape[0]
    for li in range(L):
        layer = {k: v[li] for k, v in stacked.items()}
        x = _block_ref(x, mask, layer, num_heads)
    return x


# ----------------------------------------------------------------------------
# Deterministic parameter init (matmul weights stored in bf16, rest in f32).
# ----------------------------------------------------------------------------
def init_params(key, vocab_size, context_length, hidden, num_layers, num_heads):
    del num_heads
    std = 0.02
    D = hidden
    f32, bf16 = jnp.float32, jnp.bfloat16
    keys = jax.random.split(key, 2 + num_layers)

    per = []
    for li in range(num_layers):
        ks = jax.random.split(keys[2 + li], 6)
        per.append({
            "ln1_g": jnp.ones((1, D), f32),
            "ln1_b": jnp.zeros((1, D), f32),
            "w_q": (std * jax.random.normal(ks[0], (D, D), f32)).astype(bf16),
            "b_q": jnp.zeros((1, D), f32),
            "w_k": (std * jax.random.normal(ks[1], (D, D), f32)).astype(bf16),
            "b_k": jnp.zeros((1, D), f32),
            "w_v": (std * jax.random.normal(ks[2], (D, D), f32)).astype(bf16),
            "b_v": jnp.zeros((1, D), f32),
            "w_o": (std * jax.random.normal(ks[3], (D, D), f32)).astype(bf16),
            "b_o": jnp.zeros((1, D), f32),
            "ln2_g": jnp.ones((1, D), f32),
            "ln2_b": jnp.zeros((1, D), f32),
            "w_fc1": (std * jax.random.normal(ks[4], (D, 4 * D), f32)).astype(bf16),
            "b_fc1": jnp.zeros((1, 4 * D), f32),
            "w_fc2": (std * jax.random.normal(ks[5], (4 * D, D), f32)).astype(bf16),
            "b_fc2": jnp.zeros((1, D), f32),
        })
    stacked = {k: jnp.stack([p[k] for p in per], axis=0) for k in per[0]}

    return {
        "token_embedding": std * jax.random.normal(keys[0], (vocab_size, D), f32),
        "position_embedding": std * jax.random.normal(keys[1], (context_length, D), f32),
        "layers": stacked,
        # ln_final params exist in __init__ but are not applied in forward
        "ln_final_g": jnp.ones((D,), f32),
        "ln_final_b": jnp.zeros((D,), f32),
    }


if __name__ == "__main__":
    # small config consistent with the module
    vocab_size = 64
    hidden = 32
    context_length = 16
    num_layers = 2
    num_heads = 4
    batch, seq = 2, 8

    key = jax.random.PRNGKey(0)
    pkey, dkey = jax.random.split(key)
    params = init_params(pkey, vocab_size, context_length, hidden, num_layers, num_heads)
    token_ids = jax.random.randint(dkey, (batch, seq), 0, vocab_size, dtype=jnp.int32)

    out = jax.block_until_ready(text_transformer_forward(token_ids, params, num_heads))
    ref = jax.block_until_ready(forward_ref(token_ids, params, num_heads))

    # bf16 matmul inputs in the kernel vs f32 reference -> loosened tolerance
    np.testing.assert_allclose(np.asarray(out), np.asarray(ref), rtol=5e-2, atol=5e-3)

    print("KERNEL_OK")
</pallas_src>

<mosaic_0001>
module attributes {stable_mosaic.version = 11 : i64} {
  func.func @transformer_stack_kernel(%arg0: i32, %arg1: i32, %arg2: memref<2x8x32xf32, #tpu.memory_space<vmem>>, %arg3: memref<1x1x32xf32, #tpu.memory_space<vmem>>, %arg4: memref<1x1x32xf32, #tpu.memory_space<vmem>>, %arg5: memref<1x32x96xbf16, #tpu.memory_space<vmem>>, %arg6: memref<1x1x96xf32, #tpu.memory_space<vmem>>, %arg7: memref<1x32x32xbf16, #tpu.memory_space<vmem>>, %arg8: memref<1x1x32xf32, #tpu.memory_space<vmem>>, %arg9: memref<1x1x32xf32, #tpu.memory_space<vmem>>, %arg10: memref<1x1x32xf32, #tpu.memory_space<vmem>>, %arg11: memref<1x32x128xbf16, #tpu.memory_space<vmem>>, %arg12: memref<1x1x128xf32, #tpu.memory_space<vmem>>, %arg13: memref<1x128x32xbf16, #tpu.memory_space<vmem>>, %arg14: memref<1x1x32xf32, #tpu.memory_space<vmem>>, %arg15: memref<2x8x32xf32, #tpu.memory_space<vmem>>) attributes {dimension_semantics = [#tpu.dimension_semantics<parallel>, #tpu.dimension_semantics<arbitrary>], iteration_bounds = array<i64: 1, 2>, scalar_prefetch = 0 : i64, scratch_operands = 0 : i64, tpu.core_type = #tpu.core_type<tc>, window_params = [{transform_indices = @transform_0, window_bounds = array<i64: 2, 8, 32>}, {transform_indices = @transform_1, window_bounds = array<i64: 1, 1, 32>}, {transform_indices = @transform_2, window_bounds = array<i64: 1, 1, 32>}, {transform_indices = @transform_3, window_bounds = array<i64: 1, 32, 96>}, {transform_indices = @transform_4, window_bounds = array<i64: 1, 1, 96>}, {transform_indices = @transform_5, window_bounds = array<i64: 1, 32, 32>}, {transform_indices = @transform_6, window_bounds = array<i64: 1, 1, 32>}, {transform_indices = @transform_7, window_bounds = array<i64: 1, 1, 32>}, {transform_indices = @transform_8, window_bounds = array<i64: 1, 1, 32>}, {transform_indices = @transform_9, window_bounds = array<i64: 1, 32, 128>}, {transform_indices = @transform_10, window_bounds = array<i64: 1, 1, 128>}, {transform_indices = @transform_11, window_bounds = array<i64: 1, 128, 32>}, {transform_indices = @transform_12, window_bounds = array<i64: 1, 1, 32>}, {transform_indices = @transform_13, window_bounds = array<i64: 2, 8, 32>}]} {
    %c0_i32 = arith.constant 0 : i32
    %0 = arith.cmpi eq, %arg1, %c0_i32 : i32
    %1 = arith.extui %0 : i1 to i32
    %c0_i32_0 = arith.constant 0 : i32
    %2 = arith.cmpi ne, %1, %c0_i32_0 : i32
    scf.if %2 {
      %c0_80 = arith.constant 0 : index
      %c0_81 = arith.constant 0 : index
      %c0_82 = arith.constant 0 : index
      %221 = vector.load %arg2[%c0_80, %c0_81, %c0_82] : memref<2x8x32xf32, #tpu.memory_space<vmem>>, vector<2x8x32xf32>
      %c0_83 = arith.constant 0 : index
      %c0_84 = arith.constant 0 : index
      %c0_85 = arith.constant 0 : index
      %222 = vector.load %arg15[%c0_83, %c0_84, %c0_85] : memref<2x8x32xf32, #tpu.memory_space<vmem>>, vector<2x8x32xf32>
      tpu.vector_store %arg15[%c0_83, %c0_84, %c0_85], %221 {strides = array<i32>} : memref<2x8x32xf32, #tpu.memory_space<vmem>>, vector<2x8x32xf32>,
    } else {
    }
    %c0 = arith.constant 0 : index
    %c0_1 = arith.constant 0 : index
    %c0_2 = arith.constant 0 : index
    %3 = vector.load %arg15[%c0, %c0_1, %c0_2] : memref<2x8x32xf32, #tpu.memory_space<vmem>>, vector<2x8x32xf32>
    %4 = vector.shape_cast %3 : vector<2x8x32xf32> to vector<16x32xf32>
    %c0_3 = arith.constant 0 : index
    %c0_4 = arith.constant 0 : index
    %c0_5 = arith.constant 0 : index
    %5 = vector.load %arg3[%c0_3, %c0_4, %c0_5] : memref<1x1x32xf32, #tpu.memory_space<vmem>>, vector<1x1x32xf32>
    %6 = vector.shape_cast %5 : vector<1x1x32xf32> to vector<1x32xf32>
    %c0_6 = arith.constant 0 : index
    %c0_7 = arith.constant 0 : index
    %c0_8 = arith.constant 0 : index
    %7 = vector.load %arg4[%c0_6, %c0_7, %c0_8] : memref<1x1x32xf32, #tpu.memory_space<vmem>>, vector<1x1x32xf32>
    %8 = vector.shape_cast %7 : vector<1x1x32xf32> to vector<1x32xf32>
    %cst = arith.constant dense<0.000000e+00> : vector<16xf32>
    %9 = vector.multi_reduction <add>, %4, %cst [1] : vector<16x32xf32> to vector<16xf32>
    %10 = vector.shape_cast %9 : vector<16xf32> to vector<16x1xf32>
    %cst_9 = arith.constant 3.200000e+01 : f32
    %11 = vector.broadcast %cst_9 : f32 to vector<16x1xf32>
    %12 = arith.divf %10, %11 : vector<16x1xf32>
    %13 = vector.broadcast %12 : vector<16x1xf32> to vector<16x32xf32>
    %14 = arith.subf %4, %13 : vector<16x32xf32>
    %15 = arith.mulf %14, %14 : vector<16x32xf32>
    %cst_10 = arith.constant dense<0.000000e+00> : vector<16xf32>
    %16 = vector.multi_reduction <add>, %15, %cst_10 [1] : vector<16x32xf32> to vector<16xf32>
    %17 = vector.shape_cast %16 : vector<16xf32> to vector<16x1xf32>
    %cst_11 = arith.constant 3.200000e+01 : f32
    %18 = vector.broadcast %cst_11 : f32 to vector<16x1xf32>
    %19 = arith.divf %17, %18 : vector<16x1xf32>
    %20 = vector.broadcast %12 : vector<16x1xf32> to vector<16x32xf32>
    %21 = arith.subf %4, %20 : vector<16x32xf32>
    %cst_12 = arith.constant 9.99999974E-6 : f32
    %22 = vector.broadcast %cst_12 : f32 to vector<16x1xf32>
    %23 = arith.addf %19, %22 : vector<16x1xf32>
    %24 = math.rsqrt %23 : vector<16x1xf32>
    %25 = vector.broadcast %24 : vector<16x1xf32> to vector<16x32xf32>
    %26 = arith.mulf %21, %25 : vector<16x32xf32>
    %27 = vector.broadcast %6 : vector<1x32xf32> to vector<16x32xf32>
    %28 = arith.mulf %26, %27 : vector<16x32xf32>
    %29 = vector.broadcast %8 : vector<1x32xf32> to vector<16x32xf32>
    %30 = arith.addf %28, %29 : vector<16x32xf32>
    %31 = arith.truncf %30 : vector<16x32xf32> to vector<16x32xbf16>
    %c0_13 = arith.constant 0 : index
    %c0_14 = arith.constant 0 : index
    %c0_15 = arith.constant 0 : index
    %32 = vector.load %arg5[%c0_13, %c0_14, %c0_15] : memref<1x32x96xbf16, #tpu.memory_space<vmem>>, vector<1x32x96xbf16>
    %33 = vector.shape_cast %32 : vector<1x32x96xbf16> to vector<32x96xbf16>
    %cst_16 = arith.constant dense<0.000000e+00> : vector<16x96xf32>
    %34 = tpu.matmul %31, %33, %cst_16 {dimension_numbers = #tpu.dot_dimension_numbers<[1], [0], [0], [1], [0, 0, 1, 1], [], []>} : vector<16x32xbf16>, vector<32x96xbf16>, vector<16x96xf32> -> vector<16x96xf32>
    %c0_17 = arith.constant 0 : index
    %c0_18 = arith.constant 0 : index
    %c0_19 = arith.constant 0 : index
    %35 = vector.load %arg6[%c0_17, %c0_18, %c0_19] : memref<1x1x96xf32, #tpu.memory_space<vmem>>, vector<1x1x96xf32>
    %36 = vector.shape_cast %35 : vector<1x1x96xf32> to vector<1x96xf32>
    %37 = vector.broadcast %36 : vector<1x96xf32> to vector<16x96xf32>
    %38 = arith.addf %34, %37 : vector<16x96xf32>
    %39 = vector.extract_strided_slice %38 {offsets = [0, 0], sizes = [16, 32], strides = [1, 1]} : vector<16x96xf32> to vector<16x32xf32>
    %cst_20 = arith.constant 0.353553385 : f32
    %40 = vector.broadcast %cst_20 : f32 to vector<16x32xf32>
    %41 = arith.mulf %39, %40 : vector<16x32xf32>
    %42 = arith.truncf %41 : vector<16x32xf32> to vector<16x32xbf16>
    %43 = vector.extract_strided_slice %38 {offsets = [0, 32], sizes = [16, 32], strides = [1, 1]} : vector<16x96xf32> to vector<16x32xf32>
    %44 = arith.truncf %43 : vector<16x32xf32> to vector<16x32xbf16>
    %45 = vector.extract_strided_slice %38 {offsets = [0, 64], sizes = [16, 32], strides = [1, 1]} : vector<16x96xf32> to vector<16x32xf32>
    %46 = arith.truncf %45 : vector<16x32xf32> to vector<16x32xbf16>
    %47 = tpu.iota {dimensions = array<i32: 0>} : vector<8x8xi32>
    %48 = tpu.iota {dimensions = array<i32: 1>} : vector<8x8xi32>
    %49 = arith.cmpi sgt, %48, %47 : vector<8x8xi32>
    %c8_i32 = arith.constant 8 : i32
    %50 = vector.broadcast %c8_i32 : i32 to vector<8x8xi32>
    %51 = arith.cmpi sge, %48, %50 : vector<8x8xi32>
    %52 = arith.ori %49, %51 : vector<8x8xi1>
    %53 = vector.extract_strided_slice %42 {offsets = [0, 0], sizes = [16, 8], strides = [1, 1]} : vector<16x32xbf16> to vector<16x8xbf16>
    %54 = vector.shape_cast %53 : vector<16x8xbf16> to vector<2x8x8xbf16>
    %55 = vector.extract_strided_slice %44 {offsets = [0, 0], sizes = [16, 8], strides = [1, 1]} : vector<16x32xbf16> to vector<16x8xbf16>
    %56 = vector.shape_cast %55 : vector<16x8xbf16> to vector<2x8x8xbf16>
    %57 = vector.extract_strided_slice %46 {offsets = [0, 0], sizes = [16, 8], strides = [1, 1]} : vector<16x32xbf16> to vector<16x8xbf16>
    %58 = vector.shape_cast %57 : vector<16x8xbf16> to vector<2x8x8xbf16>
    "tpu.trace_start"() <{level = 10 : i32, message = "bqd,bkd->bqk"}> : () -> ()
    %cst_21 = arith.constant dense<0.000000e+00> : vector<2x8x8xf32>
    %59 = tpu.matmul %54, %56, %cst_21 {dimension_numbers = #tpu.dot_dimension_numbers<[2], [2], [1], [1], [0, 0, 0, 1, 1, 1], [0], [0]>} : vector<2x8x8xbf16>, vector<2x8x8xbf16>, vector<2x8x8xf32> -> vector<2x8x8xf32>
    "tpu.trace_stop"() : () -> ()
    %60 = vector.shape_cast %52 : vector<8x8xi1> to vector<1x8x8xi1>
    %cst_22 = arith.constant -1.000000e+30 : f32
    %61 = vector.shape_cast %60 : vector<1x8x8xi1> to vector<1x8x8xi1>
    %62 = vector.broadcast %61 : vector<1x8x8xi1> to vector<2x8x8xi1>
    %63 = vector.broadcast %cst_22 : f32 to vector<2x8x8xf32>
    %64 = arith.select %62, %63, %59 : vector<2x8x8xi1>, vector<2x8x8xf32>
    %cst_23 = arith.constant dense<0xFF800000> : vector<2x8xf32>
    %65 = vector.multi_reduction <maximumf>, %64, %cst_23 [2] : vector<2x8x8xf32> to vector<2x8xf32>
    %66 = vector.shape_cast %65 : vector<2x8xf32> to vector<2x8x1xf32>
    %67 = vector.broadcast %66 : vector<2x8x1xf32> to vector<2x8x8xf32>
    %68 = arith.subf %64, %67 : vector<2x8x8xf32>
    %69 = math.exp %68 : vector<2x8x8xf32>
    %cst_24 = arith.constant dense<0.000000e+00> : vector<2x8xf32>
    %70 = vector.multi_reduction <add>, %69, %cst_24 [2] : vector<2x8x8xf32> to vector<2x8xf32>
    %71 = vector.shape_cast %70 : vector<2x8xf32> to vector<2x8x1xf32>
    %72 = tpu.reciprocal %71 {approx = true} : vector<2x8x1xf32> -> vector<2x8x1xf32>
    %73 = vector.broadcast %72 : vector<2x8x1xf32> to vector<2x8x8xf32>
    %74 = arith.mulf %69, %73 : vector<2x8x8xf32>
    %75 = arith.truncf %74 : vector<2x8x8xf32> to vector<2x8x8xbf16>
    "tpu.trace_start"() <{level = 10 : i32, message = "bqk,bkd->bqd"}> : () -> ()
    %cst_25 = arith.constant dense<0.000000e+00> : vector<2x8x8xf32>
    %76 = tpu.matmul %75, %58, %cst_25 {dimension_numbers = #tpu.dot_dimension_numbers<[2], [1], [1], [2], [0, 0, 0, 1, 1, 2], [0], [0]>} : vector<2x8x8xbf16>, vector<2x8x8xbf16>, vector<2x8x8xf32> -> vector<2x8x8xf32>
    "tpu.trace_stop"() : () -> ()
    %77 = vector.shape_cast %76 : vector<2x8x8xf32> to vector<16x8xf32>
    %78 = vector.extract_strided_slice %42 {offsets = [0, 8], sizes = [16, 8], strides = [1, 1]} : vector<16x32xbf16> to vector<16x8xbf16>
    %79 = vector.shape_cast %78 : vector<16x8xbf16> to vector<2x8x8xbf16>
    %80 = vector.extract_strided_slice %44 {offsets = [0, 8], sizes = [16, 8], strides = [1, 1]} : vector<16x32xbf16> to vector<16x8xbf16>
    %81 = vector.shape_cast %80 : vector<16x8xbf16> to vector<2x8x8xbf16>
    %82 = vector.extract_strided_slice %46 {offsets = [0, 8], sizes = [16, 8], strides = [1, 1]} : vector<16x32xbf16> to vector<16x8xbf16>
    %83 = vector.shape_cast %82 : vector<16x8xbf16> to vector<2x8x8xbf16>
    "tpu.trace_start"() <{level = 10 : i32, message = "bqd,bkd->bqk"}> : () -> ()
    %cst_26 = arith.constant dense<0.000000e+00> : vector<2x8x8xf32>
    %84 = tpu.matmul %79, %81, %cst_26 {dimension_numbers = #tpu.dot_dimension_numbers<[2], [2], [1], [1], [0, 0, 0, 1, 1, 1], [0], [0]>} : vector<2x8x8xbf16>, vector<2x8x8xbf16>, vector<2x8x8xf32> -> vector<2x8x8xf32>
    "tpu.trace_stop"() : () -> ()
    %85 = vector.shape_cast %52 : vector<8x8xi1> to vector<1x8x8xi1>
    %cst_27 = arith.constant -1.000000e+30 : f32
    %86 = vector.shape_cast %85 : vector<1x8x8xi1> to vector<1x8x8xi1>
    %87 = vector.broadcast %86 : vector<1x8x8xi1> to vector<2x8x8xi1>
    %88 = vector.broadcast %cst_27 : f32 to vector<2x8x8xf32>
    %89 = arith.select %87, %88, %84 : vector<2x8x8xi1>, vector<2x8x8xf32>
    %cst_28 = arith.constant dense<0xFF800000> : vector<2x8xf32>
    %90 = vector.multi_reduction <maximumf>, %89, %cst_28 [2] : vector<2x8x8xf32> to vector<2x8xf32>
    %91 = vector.shape_cast %90 : vector<2x8xf32> to vector<2x8x1xf32>
    %92 = vector.broadcast %91 : vector<2x8x1xf32> to vector<2x8x8xf32>
    %93 = arith.subf %89, %92 : vector<2x8x8xf32>
    %94 = math.exp %93 : vector<2x8x8xf32>
    %cst_29 = arith.constant dense<0.000000e+00> : vector<2x8xf32>
    %95 = vector.multi_reduction <add>, %94, %cst_29 [2] : vector<2x8x8xf32> to vector<2x8xf32>
    %96 = vector.shape_cast %95 : vector<2x8xf32> to vector<2x8x1xf32>
    %97 = tpu.reciprocal %96 {approx = true} : vector<2x8x1xf32> -> vector<2x8x1xf32>
    %98 = vector.broadcast %97 : vector<2x8x1xf32> to vector<2x8x8xf32>
    %99 = arith.mulf %94, %98 : vector<2x8x8xf32>
    %100 = arith.truncf %99 : vector<2x8x8xf32> to vector<2x8x8xbf16>
    "tpu.trace_start"() <{level = 10 : i32, message = "bqk,bkd->bqd"}> : () -> ()
    %cst_30 = arith.constant dense<0.000000e+00> : vector<2x8x8xf32>
    %101 = tpu.matmul %100, %83, %cst_30 {dimension_numbers = #tpu.dot_dimension_numbers<[2], [1], [1], [2], [0, 0, 0, 1, 1, 2], [0], [0]>} : vector<2x8x8xbf16>, vector<2x8x8xbf16>, vector<2x8x8xf32> -> vector<2x8x8xf32>
    "tpu.trace_stop"() : () -> ()
    %102 = vector.shape_cast %101 : vector<2x8x8xf32> to vector<16x8xf32>
    %103 = vector.extract_strided_slice %42 {offsets = [0, 16], sizes = [16, 8], strides = [1, 1]} : vector<16x32xbf16> to vector<16x8xbf16>
    %104 = vector.shape_cast %103 : vector<16x8xbf16> to vector<2x8x8xbf16>
    %105 = vector.extract_strided_slice %44 {offsets = [0, 16], sizes = [16, 8], strides = [1, 1]} : vector<16x32xbf16> to vector<16x8xbf16>
    %106 = vector.shape_cast %105 : vector<16x8xbf16> to vector<2x8x8xbf16>
    %107 = vector.extract_strided_slice %46 {offsets = [0, 16], sizes = [16, 8], strides = [1, 1]} : vector<16x32xbf16> to vector<16x8xbf16>
    %108 = vector.shape_cast %107 : vector<16x8xbf16> to vector<2x8x8xbf16>
    "tpu.trace_start"() <{level = 10 : i32, message = "bqd,bkd->bqk"}> : () -> ()
    %cst_31 = arith.constant dense<0.000000e+00> : vector<2x8x8xf32>
    %109 = tpu.matmul %104, %106, %cst_31 {dimension_numbers = #tpu.dot_dimension_numbers<[2], [2], [1], [1], [0, 0, 0, 1, 1, 1], [0], [0]>} : vector<2x8x8xbf16>, vector<2x8x8xbf16>, vector<2x8x8xf32> -> vector<2x8x8xf32>
    "tpu.trace_stop"() : () -> ()
    %110 = vector.shape_cast %52 : vector<8x8xi1> to vector<1x8x8xi1>
    %cst_32 = arith.constant -1.000000e+30 : f32
    %111 = vector.shape_cast %110 : vector<1x8x8xi1> to vector<1x8x8xi1>
    %112 = vector.broadcast %111 : vector<1x8x8xi1> to vector<2x8x8xi1>
    %113 = vector.broadcast %cst_32 : f32 to vector<2x8x8xf32>
    %114 = arith.select %112, %113, %109 : vector<2x8x8xi1>, vector<2x8x8xf32>
    %cst_33 = arith.constant dense<0xFF800000> : vector<2x8xf32>
    %115 = vector.multi_reduction <maximumf>, %114, %cst_33 [2] : vector<2x8x8xf32> to vector<2x8xf32>
    %116 = vector.shape_cast %115 : vector<2x8xf32> to vector<2x8x1xf32>
    %117 = vector.broadcast %116 : vector<2x8x1xf32> to vector<2x8x8xf32>
    %118 = arith.subf %114, %117 : vector<2x8x8xf32>
    %119 = math.exp %118 : vector<2x8x8xf32>
    %cst_34 = arith.constant dense<0.000000e+00> : vector<2x8xf32>
    %120 = vector.multi_reduction <add>, %119, %cst_34 [2] : vector<2x8x8xf32> to vector<2x8xf32>
    %121 = vector.shape_cast %120 : vector<2x8xf32> to vector<2x8x1xf32>
    %122 = tpu.reciprocal %121 {approx = true} : vector<2x8x1xf32> -> vector<2x8x1xf32>
    %123 = vector.broadcast %122 : vector<2x8x1xf32> to vector<2x8x8xf32>
    %124 = arith.mulf %119, %123 : vector<2x8x8xf32>
    %125 = arith.truncf %124 : vector<2x8x8xf32> to vector<2x8x8xbf16>
    "tpu.trace_start"() <{level = 10 : i32, message = "bqk,bkd->bqd"}> : () -> ()
    %cst_35 = arith.constant dense<0.000000e+00> : vector<2x8x8xf32>
    %126 = tpu.matmul %125, %108, %cst_35 {dimension_numbers = #tpu.dot_dimension_numbers<[2], [1], [1], [2], [0, 0, 0, 1, 1, 2], [0], [0]>} : vector<2x8x8xbf16>, vector<2x8x8xbf16>, vector<2x8x8xf32> -> vector<2x8x8xf32>
    "tpu.trace_stop"() : () -> ()
    %127 = vector.shape_cast %126 : vector<2x8x8xf32> to vector<16x8xf32>
    %128 = vector.extract_strided_slice %42 {offsets = [0, 24], sizes = [16, 8], strides = [1, 1]} : vector<16x32xbf16> to vector<16x8xbf16>
    %129 = vector.shape_cast %128 : vector<16x8xbf16> to vector<2x8x8xbf16>
    %130 = vector.extract_strided_slice %44 {offsets = [0, 24], sizes = [16, 8], strides = [1, 1]} : vector<16x32xbf16> to vector<16x8xbf16>
    %131 = vector.shape_cast %130 : vector<16x8xbf16> to vector<2x8x8xbf16>
    %132 = vector.extract_strided_slice %46 {offsets = [0, 24], sizes = [16, 8], strides = [1, 1]} : vector<16x32xbf16> to vector<16x8xbf16>
    %133 = vector.shape_cast %132 : vector<16x8xbf16> to vector<2x8x8xbf16>
    "tpu.trace_start"() <{level = 10 : i32, message = "bqd,bkd->bqk"}> : () -> ()
    %cst_36 = arith.constant dense<0.000000e+00> : vector<2x8x8xf32>
    %134 = tpu.matmul %129, %131, %cst_36 {dimension_numbers = #tpu.dot_dimension_numbers<[2], [2], [1], [1], [0, 0, 0, 1, 1, 1], [0], [0]>} : vector<2x8x8xbf16>, vector<2x8x8xbf16>, vector<2x8x8xf32> -> vector<2x8x8xf32>
    "tpu.trace_stop"() : () -> ()
    %135 = vector.shape_cast %52 : vector<8x8xi1> to vector<1x8x8xi1>
    %cst_37 = arith.constant -1.000000e+30 : f32
    %136 = vector.shape_cast %135 : vector<1x8x8xi1> to vector<1x8x8xi1>
    %137 = vector.broadcast %136 : vector<1x8x8xi1> to vector<2x8x8xi1>
    %138 = vector.broadcast %cst_37 : f32 to vector<2x8x8xf32>
    %139 = arith.select %137, %138, %134 : vector<2x8x8xi1>, vector<2x8x8xf32>
    %cst_38 = arith.constant dense<0xFF800000> : vector<2x8xf32>
    %140 = vector.multi_reduction <maximumf>, %139, %cst_38 [2] : vector<2x8x8xf32> to vector<2x8xf32>
    %141 = vector.shape_cast %140 : vector<2x8xf32> to vector<2x8x1xf32>
    %142 = vector.broadcast %141 : vector<2x8x1xf32> to vector<2x8x8xf32>
    %143 = arith.subf %139, %142 : vector<2x8x8xf32>
    %144 = math.exp %143 : vector<2x8x8xf32>
    %cst_39 = arith.constant dense<0.000000e+00> : vector<2x8xf32>
    %145 = vector.multi_reduction <add>, %144, %cst_39 [2] : vector<2x8x8xf32> to vector<2x8xf32>
    %146 = vector.shape_cast %145 : vector<2x8xf32> to vector<2x8x1xf32>
    %147 = tpu.reciprocal %146 {approx = true} : vector<2x8x1xf32> -> vector<2x8x1xf32>
    %148 = vector.broadcast %147 : vector<2x8x1xf32> to vector<2x8x8xf32>
    %149 = arith.mulf %144, %148 : vector<2x8x8xf32>
    %150 = arith.truncf %149 : vector<2x8x8xf32> to vector<2x8x8xbf16>
    "tpu.trace_start"() <{level = 10 : i32, message = "bqk,bkd->bqd"}> : () -> ()
    %cst_40 = arith.constant dense<0.000000e+00> : vector<2x8x8xf32>
    %151 = tpu.matmul %150, %133, %cst_40 {dimension_numbers = #tpu.dot_dimension_numbers<[2], [1], [1], [2], [0, 0, 0, 1, 1, 2], [0], [0]>} : vector<2x8x8xbf16>, vector<2x8x8xbf16>, vector<2x8x8xf32> -> vector<2x8x8xf32>
    "tpu.trace_stop"() : () -> ()
    %152 = vector.shape_cast %151 : vector<2x8x8xf32> to vector<16x8xf32>
    %153 = tpu.concatenate %77, %102, %127, %152 in 1 : vector<16x8xf32>, vector<16x8xf32>, vector<16x8xf32>, vector<16x8xf32> -> vector<16x32xf32>
    %154 = arith.truncf %153 : vector<16x32xf32> to vector<16x32xbf16>
    %c0_41 = arith.constant 0 : index
    %c0_42 = arith.constant 0 : index
    %c0_43 = arith.constant 0 : index
    %155 = vector.load %arg7[%c0_41, %c0_42, %c0_43] : memref<1x32x32xbf16, #tpu.memory_space<vmem>>, vector<1x32x32xbf16>
    %156 = vector.shape_cast %155 : vector<1x32x32xbf16> to vector<32x32xbf16>
    %cst_44 = arith.constant dense<0.000000e+00> : vector<16x32xf32>
    %157 = tpu.matmul %154, %156, %cst_44 {dimension_numbers = #tpu.dot_dimension_numbers<[1], [0], [0], [1], [0, 0, 1, 1], [], []>} : vector<16x32xbf16>, vector<32x32xbf16>, vector<16x32xf32> -> vector<16x32xf32>
    %c0_45 = arith.constant 0 : index
    %c0_46 = arith.constant 0 : index
    %c0_47 = arith.constant 0 : index
    %158 = vector.load %arg8[%c0_45, %c0_46, %c0_47] : memref<1x1x32xf32, #tpu.memory_space<vmem>>, vector<1x1x32xf32>
    %159 = vector.shape_cast %158 : vector<1x1x32xf32> to vector<1x32xf32>
    %160 = vector.broadcast %159 : vector<1x32xf32> to vector<16x32xf32>
    %161 = arith.addf %157, %160 : vector<16x32xf32>
    %162 = arith.addf %4, %161 : vector<16x32xf32>
    %c0_48 = arith.constant 0 : index
    %c0_49 = arith.constant 0 : index
    %c0_50 = arith.constant 0 : index
    %163 = vector.load %arg9[%c0_48, %c0_49, %c0_50] : memref<1x1x32xf32, #tpu.memory_space<vmem>>, vector<1x1x32xf32>
    %164 = vector.shape_cast %163 : vector<1x1x32xf32> to vector<1x32xf32>
    %c0_51 = arith.constant 0 : index
    %c0_52 = arith.constant 0 : index
    %c0_53 = arith.constant 0 : index
    %165 = vector.load %arg10[%c0_51, %c0_52, %c0_53] : memref<1x1x32xf32, #tpu.memory_space<vmem>>, vector<1x1x32xf32>
    %166 = vector.shape_cast %165 : vector<1x1x32xf32> to vector<1x32xf32>
    %cst_54 = arith.constant dense<0.000000e+00> : vector<16xf32>
    %167 = vector.multi_reduction <add>, %162, %cst_54 [1] : vector<16x32xf32> to vector<16xf32>
    %168 = vector.shape_cast %167 : vector<16xf32> to vector<16x1xf32>
    %cst_55 = arith.constant 3.200000e+01 : f32
    %169 = vector.broadcast %cst_55 : f32 to vector<16x1xf32>
    %170 = arith.divf %168, %169 : vector<16x1xf32>
    %171 = vector.broadcast %170 : vector<16x1xf32> to vector<16x32xf32>
    %172 = arith.subf %162, %171 : vector<16x32xf32>
    %173 = arith.mulf %172, %172 : vector<16x32xf32>
    %cst_56 = arith.constant dense<0.000000e+00> : vector<16xf32>
    %174 = vector.multi_reduction <add>, %173, %cst_56 [1] : vector<16x32xf32> to vector<16xf32>
    %175 = vector.shape_cast %174 : vector<16xf32> to vector<16x1xf32>
    %cst_57 = arith.constant 3.200000e+01 : f32
    %176 = vector.broadcast %cst_57 : f32 to vector<16x1xf32>
    %177 = arith.divf %175, %176 : vector<16x1xf32>
    %178 = vector.broadcast %170 : vector<16x1xf32> to vector<16x32xf32>
    %179 = arith.subf %162, %178 : vector<16x32xf32>
    %cst_58 = arith.constant 9.99999974E-6 : f32
    %180 = vector.broadcast %cst_58 : f32 to vector<16x1xf32>
    %181 = arith.addf %177, %180 : vector<16x1xf32>
    %182 = math.rsqrt %181 : vector<16x1xf32>
    %183 = vector.broadcast %182 : vector<16x1xf32> to vector<16x32xf32>
    %184 = arith.mulf %179, %183 : vector<16x32xf32>
    %185 = vector.broadcast %164 : vector<1x32xf32> to vector<16x32xf32>
    %186 = arith.mulf %184, %185 : vector<16x32xf32>
    %187 = vector.broadcast %166 : vector<1x32xf32> to vector<16x32xf32>
    %188 = arith.addf %186, %187 : vector<16x32xf32>
    %189 = arith.truncf %188 : vector<16x32xf32> to vector<16x32xbf16>
    %c0_59 = arith.constant 0 : index
    %c0_60 = arith.constant 0 : index
    %c0_61 = arith.constant 0 : index
    %190 = vector.load %arg11[%c0_59, %c0_60, %c0_61] : memref<1x32x128xbf16, #tpu.memory_space<vmem>>, vector<1x32x128xbf16>
    %191 = vector.shape_cast %190 : vector<1x32x128xbf16> to vector<32x128xbf16>
    %cst_62 = arith.constant dense<0.000000e+00> : vector<16x128xf32>
    %192 = tpu.matmul %189, %191, %cst_62 {dimension_numbers = #tpu.dot_dimension_numbers<[1], [0], [0], [1], [0, 0, 1, 1], [], []>} : vector<16x32xbf16>, vector<32x128xbf16>, vector<16x128xf32> -> vector<16x128xf32>
    %c0_63 = arith.constant 0 : index
    %c0_64 = arith.constant 0 : index
    %c0_65 = arith.constant 0 : index
    %193 = vector.load %arg12[%c0_63, %c0_64, %c0_65] : memref<1x1x128xf32, #tpu.memory_space<vmem>>, vector<1x1x128xf32>
    %194 = vector.shape_cast %193 : vector<1x1x128xf32> to vector<1x128xf32>
    %195 = vector.broadcast %194 : vector<1x128xf32> to vector<16x128xf32>
    %196 = arith.addf %192, %195 : vector<16x128xf32>
    %cst_66 = arith.constant 5.000000e-01 : f32
    %197 = vector.broadcast %cst_66 : f32 to vector<16x128xf32>
    %198 = arith.mulf %197, %196 : vector<16x128xf32>
    %cst_67 = arith.constant 4.471500e-02 : f32
    %199 = vector.broadcast %cst_67 : f32 to vector<16x128xf32>
    %200 = arith.mulf %199, %196 : vector<16x128xf32>
    %201 = arith.mulf %200, %196 : vector<16x128xf32>
    %202 = arith.mulf %201, %196 : vector<16x128xf32>
    %203 = arith.addf %196, %202 : vector<16x128xf32>
    %cst_68 = arith.constant 0.797884583 : f32
    %204 = vector.broadcast %cst_68 : f32 to vector<16x128xf32>
    %205 = arith.mulf %204, %203 : vector<16x128xf32>
    %206 = math.tanh %205 : vector<16x128xf32>
    %cst_69 = arith.constant 1.000000e+00 : f32
    %207 = vector.broadcast %cst_69 : f32 to vector<16x128xf32>
    %208 = arith.addf %207, %206 : vector<16x128xf32>
    %209 = arith.mulf %198, %208 : vector<16x128xf32>
    %210 = arith.truncf %209 : vector<16x128xf32> to vector<16x128xbf16>
    %c0_70 = arith.constant 0 : index
    %c0_71 = arith.constant 0 : index
    %c0_72 = arith.constant 0 : index
    %211 = vector.load %arg13[%c0_70, %c0_71, %c0_72] : memref<1x128x32xbf16, #tpu.memory_space<vmem>>, vector<1x128x32xbf16>
    %212 = vector.shape_cast %211 : vector<1x128x32xbf16> to vector<128x32xbf16>
    %cst_73 = arith.constant dense<0.000000e+00> : vector<16x32xf32>
    %213 = tpu.matmul %210, %212, %cst_73 {dimension_numbers = #tpu.dot_dimension_numbers<[1], [0], [0], [1], [0, 0, 1, 1], [], []>} : vector<16x128xbf16>, vector<128x32xbf16>, vector<16x32xf32> -> vector<16x32xf32>
    %c0_74 = arith.constant 0 : index
    %c0_75 = arith.constant 0 : index
    %c0_76 = arith.constant 0 : index
    %214 = vector.load %arg14[%c0_74, %c0_75, %c0_76] : memref<1x1x32xf32, #tpu.memory_space<vmem>>, vector<1x1x32xf32>
    %215 = vector.shape_cast %214 : vector<1x1x32xf32> to vector<1x32xf32>
    %216 = vector.broadcast %215 : vector<1x32xf32> to vector<16x32xf32>
    %217 = arith.addf %213, %216 : vector<16x32xf32>
    %218 = arith.addf %162, %217 : vector<16x32xf32>
    %219 = vector.shape_cast %218 : vector<16x32xf32> to vector<2x8x32xf32>
    %c0_77 = arith.constant 0 : index
    %c0_78 = arith.constant 0 : index
    %c0_79 = arith.constant 0 : index
    %220 = vector.load %arg15[%c0_77, %c0_78, %c0_79] : memref<2x8x32xf32, #tpu.memory_space<vmem>>, vector<2x8x32xf32>
    tpu.vector_store %arg15[%c0_77, %c0_78, %c0_79], %219 {strides = array<i32>} : memref<2x8x32xf32, #tpu.memory_space<vmem>>, vector<2x8x32xf32>,
    return
  }
  func.func @transform_0(%arg0: i32, %arg1: i32) -> (i32, i32, i32) {
    %c0_i32 = arith.constant 0 : i32
    %c0_i32_0 = arith.constant 0 : i32
    %c0_i32_1 = arith.constant 0 : i32
    return %arg0, %c0_i32, %c0_i32_0 : i32, i32, i32
  }
  func.func @transform_1(%arg0: i32, %arg1: i32) -> (i32, i32, i32) {
    %c0_i32 = arith.constant 0 : i32
    %c0_i32_0 = arith.constant 0 : i32
    %c0_i32_1 = arith.constant 0 : i32
    return %arg1, %c0_i32, %c0_i32_0 : i32, i32, i32
  }
  func.func @transform_2(%arg0: i32, %arg1: i32) -> (i32, i32, i32) {
    %c0_i32 = arith.constant 0 : i32
    %c0_i32_0 = arith.constant 0 : i32
    %c0_i32_1 = arith.constant 0 : i32
    return %arg1, %c0_i32, %c0_i32_0 : i32, i32, i32
  }
  func.func @transform_3(%arg0: i32, %arg1: i32) -> (i32, i32, i32) {
    %c0_i32 = arith.constant 0 : i32
    %c0_i32_0 = arith.constant 0 : i32
    %c0_i32_1 = arith.constant 0 : i32
    return %arg1, %c0_i32, %c0_i32_0 : i32, i32, i32
  }
  func.func @transform_4(%arg0: i32, %arg1: i32) -> (i32, i32, i32) {
    %c0_i32 = arith.constant 0 : i32
    %c0_i32_0 = arith.constant 0 : i32
    %c0_i32_1 = arith.constant 0 : i32
    return %arg1, %c0_i32, %c0_i32_0 : i32, i32, i32
  }
  func.func @transform_5(%arg0: i32, %arg1: i32) -> (i32, i32, i32) {
    %c0_i32 = arith.constant 0 : i32
    %c0_i32_0 = arith.constant 0 : i32
    %c0_i32_1 = arith.constant 0 : i32
    return %arg1, %c0_i32, %c0_i32_0 : i32, i32, i32
  }
  func.func @transform_6(%arg0: i32, %arg1: i32) -> (i32, i32, i32) {
    %c0_i32 = arith.constant 0 : i32
    %c0_i32_0 = arith.constant 0 : i32
    %c0_i32_1 = arith.constant 0 : i32
    return %arg1, %c0_i32, %c0_i32_0 : i32, i32, i32
  }
  func.func @transform_7(%arg0: i32, %arg1: i32) -> (i32, i32, i32) {
    %c0_i32 = arith.constant 0 : i32
    %c0_i32_0 = arith.constant 0 : i32
    %c0_i32_1 = arith.constant 0 : i32
    return %arg1, %c0_i32, %c0_i32_0 : i32, i32, i32
  }
  func.func @transform_8(%arg0: i32, %arg1: i32) -> (i32, i32, i32) {
    %c0_i32 = arith.constant 0 : i32
    %c0_i32_0 = arith.constant 0 : i32
    %c0_i32_1 = arith.constant 0 : i32
    return %arg1, %c0_i32, %c0_i32_0 : i32, i32, i32
  }
  func.func @transform_9(%arg0: i32, %arg1: i32) -> (i32, i32, i32) {
    %c0_i32 = arith.constant 0 : i32
    %c0_i32_0 = arith.constant 0 : i32
    %c0_i32_1 = arith.constant 0 : i32
    return %arg1, %c0_i32, %c0_i32_0 : i32, i32, i32
  }
  func.func @transform_10(%arg0: i32, %arg1: i32) -> (i32, i32, i32) {
    %c0_i32 = arith.constant 0 : i32
    %c0_i32_0 = arith.constant 0 : i32
    %c0_i32_1 = arith.constant 0 : i32
    return %arg1, %c0_i32, %c0_i32_0 : i32, i32, i32
  }
  func.func @transform_11(%arg0: i32, %arg1: i32) -> (i32, i32, i32) {
    %c0_i32 = arith.constant 0 : i32
    %c0_i32_0 = arith.constant 0 : i32
    %c0_i32_1 = arith.constant 0 : i32
    return %arg1, %c0_i32, %c0_i32_0 : i32, i32, i32
  }
  func.func @transform_12(%arg0: i32, %arg1: i32) -> (i32, i32, i32) {
    %c0_i32 = arith.constant 0 : i32
    %c0_i32_0 = arith.constant 0 : i32
    %c0_i32_1 = arith.constant 0 : i32
    return %arg1, %c0_i32, %c0_i32_0 : i32, i32, i32
  }
  func.func @transform_13(%arg0: i32, %arg1: i32) -> (i32, i32, i32) {
    %c0_i32 = arith.constant 0 : i32
    %c0_i32_0 = arith.constant 0 : i32
    %c0_i32_1 = arith.constant 0 : i32
    return %arg0, %c0_i32, %c0_i32_0 : i32, i32, i32
  }
}

</mosaic_0001>

<bundles_post_ra>
// kernel: tpu_custom_call.1
= control target key start
LH: loop header
LB: loop body
LE: loop exit
PB: predicated region body
PF: predicated region fallthrough
CT: control target
= control target key end

     0   :  { %s3183_s0 = inlined_call_operand.hbm [shape: f32[2,8,32], index: 0, kind: input, shape index: {}, may-alias: {0,13}]   ;;  %s3184_s1 = inlined_call_operand.vmem [shape: f32[2,1,32], index: 1, kind: input, shape index: {}]   ;;  %s3185_s2 = inlined_call_operand.vmem [shape: f32[2,1,32], index: 2, kind: input, shape index: {}]   ;;  %s3186_s3 = inlined_call_operand.vmem [shape: bf16[2,32,96], index: 3, kind: input, shape index: {}]   ;;  %s3187_s4 = inlined_call_operand.vmem [shape: f32[2,1,96], index: 4, kind: input, shape index: {}]   ;;  %s3188_s5 = inlined_call_operand.vmem [shape: bf16[2,32,32], index: 5, kind: input, shape index: {}]   ;;  %s3189_s6 = inlined_call_operand.vmem [shape: f32[2,1,32], index: 6, kind: input, shape index: {}]   ;;  %s3190_s7 = inlined_call_operand.vmem [shape: f32[2,1,32], index: 7, kind: input, shape index: {}]   ;;  %s3191_s8 = inlined_call_operand.vmem [shape: f32[2,1,32], index: 8, kind: input, shape index: {}]   ;;  %s3192_s9 = inlined_call_operand.vmem [shape: bf16[2,32,128], index: 9, kind: input, shape index: {}]   ;;  %s3193_s10 = inlined_call_operand.vmem [shape: f32[2,1,128], index: 10, kind: input, shape index: {}]   ;;  %s3194_s11 = inlined_call_operand.vmem [shape: bf16[2,128,32], index: 11, kind: input, shape index: {}]   ;;  %s3195_s12 = inlined_call_operand.vmem [shape: f32[2,1,32], index: 12, kind: input, shape index: {}]   ;;  %s3196_s13 = inlined_call_operand.hbm [shape: f32[2,8,32], index: 13, kind: output, shape index: {}, may-alias: {0,13}]  }
   0x1   :  { %3200 = sst [smem:[#allocation11_spill]] %s3183_s0 }
   0x2   :  { %3201 = sst [smem:[#allocation12_spill]] %s3186_s3 }
   0x3   :  { %3202 = sst [smem:[#allocation13_spill]] %s3188_s5 }
   0x4   :  { %3203 = sst [smem:[#allocation14_spill]] %s3196_s13 }
   0x5   :  { %18 = vsyncpa [#allocation3], 0 }
   0x6   :  { %19 = vsyncpa [#allocation4], 0  ;;  %s2778_s25 = smov 0   ;;  %s2780_s26 = smov 0  }
   0x7   :  { %s2782_s27 = smov 0  }
   0x8 LB: > { %3204 = sst [smem:[#allocation8_spill]] %s2681_s26  ;;  %s3197_s28 = sadd.s32 4294967295, %s2685_s27   ;;  %s2685_s27 = sphi %s2782_s27, %s25_s27   ;;  %s2681_s26 = sphi %s2780_s26, %s3224_s26   ;;  %s2677_s25 = sphi %s2778_s25, %s3223_s25  }
   0x9   : > { %3205 = sst [smem:[#allocation9_spill]] %s2685_s27  ;;  %s34_s29 = sadd.s32 1, %s2681_s26 }
   0xa   : > { %p35_p0 = scmp.ge.s32.totalorder %s34_s29, 2  ;;  %p2210_p1 = scmp.ge.s32.totalorder %s2685_s27, 1 }
   0xb   : > { %p406_p2 = scmp.lt.s32.totalorder %s2685_s27, 3  ;;  %p2805_p4 = scmp.eq.s32.totalorder %s3197_s28, 0 }
   0xc   : > { %s3226_s29 = smov (%p35_p0, %s34_s29), 0  ;;  %s2687_s15 = smov [#allocation2]  }
   0xd   : > { %3206 = sst [smem:[#allocation10_spill]] %s3226_s29  ;;  %p2799_p3 = pnand %p2210_p1, %p406_p2 }
   0xe   : > { %s421_s16 = sshll.u32 %s2687_s15, 4  ;;  %s422_s16 = int_to_ptr.vmem [resolvable:$true] %s421_s16 }
   0xf   : > { %p2479_p5 = pneg %p2799_p3  ;;  %s2616_s17 = scalar_lea.vmem %s422_s16, 256 }
  0x10   : > { %p2617_p8 = scmp.ne.s32.totalorder %s422_s16, %s2616_s17  ;;  %p2624_p11 = scmp.lt.s32.totalorder %s422_s16, %s422_s16 }
  0x11   : > { %p2480_p6 = pnand %p2805_p4, %p2479_p5  ;;  %p2625_p12 = scmp.lt.s32.totalorder %s2616_s17, %s2616_s17 }
  0x13   : > { %p2607_p7 = pneg %p2480_p6  ;;  %p2626_p13 = por %p2625_p12, %p2624_p11 }
  0x15   : > { %p2619_p9 = pnand %p2617_p8, %p2607_p7 }
  0x17   : > { %p2620_p10 = pneg %p2619_p9 }
  0x19   : > { %p2627_p0 = pnand %p2626_p13, %p2620_p10 }
  0x1b   : > { %2630 = shalt.err (!%p2627_p0)
}
  0x1c   : > { %s2688_s18 = smov 128   ;;  %s2689_s19 = smov 8  }
  0x1d   : > { %s3209_s0 = sld [smem:[#allocation11_spill]] }
  0x1f   : > { %517 = sbr.rel (%p2799_p3) target bundleno = 4025 (0xfb9), region = 72 }
  0x23   : > { %2482 = dma.hbm_to_vmem [thread:$0]  (!%p2480_p6), %s3209_s0, 256, %s422_s16, [#allocation3], %s2688_s18, %s2688_s18, %s2689_s19  }
  0x24   : > { %2668 = dma.done.wait (%p2805_p4), [#allocation3], 256  }
  0x25   : > { %2670 = vsyncadd (%p2805_p4), [#allocation3], 4294967040  ;;  %p596_p1 = scmp.lt.s32.totalorder %s2677_s25, 1  ;;  %s3210_s3 = sld [smem:[#allocation12_spill]] }
  0x26   : > { %s3211_s5 = sld [smem:[#allocation13_spill]]  ;;  %p2223_p2 = scmp.ne.s32.totalorder %s2677_s25, 0 }
  0x27   : > { %s2824_s22 = scalar_select %p596_p1, %s2677_s25, 1 }
  0x29   : > { %s2273_s17 = sshll.u32 %s2824_s22, 4  ;;  %s620_s13 = scalar_lea.vmem %s3190_s7, %s2824_s22 }
  0x2a   : > { %s623_s20 = scalar_lea.vmem %s3191_s8, %s2824_s22  ;;  %s2276_s27 = sshll.u32 %s2824_s22, 6 }
  0x2b   : > { %s2842_s24 = scalar_lea.vmem %s3210_s3, %s2273_s17  ;;  %s2864_s3 = scalar_lea.vmem %s3192_s9, %s2273_s17 }
  0x2c   : > { %s2847_s29 = scalar_lea.vmem %s3211_s5, %s2273_s17  ;;  %s631_s5 = scalar_lea.vmem %s3193_s10, %s2824_s22 }
  0x2d   : > { %s2874_s14 = scalar_lea.vmem %s3194_s11, %s2276_s27  ;;  %s639_s18 = scalar_lea.vmem %s3195_s12, %s2824_s22 }
  0x2e   : > { %645 = sbr.rel (%p2223_p2) target bundleno = 53 (0x35), region = 80 }
  0x33   : > { %v646_v0 = vld [vmem:[#allocation2] sm:$0xff]  ;;  %vm648_vm0 = vcmask 261120   ;;  %v647_v1 = vld [vmem:[#allocation2 + $0x8] sm:$0xff] }
  0x34   : > { %649 = vst.msk [vmem:[#allocation5] sm:$0xff] %vm648_vm0, %v646_v0  ;;  %650 = vst.msk [vmem:[#allocation5 + $0x8] sm:$0xff] %vm648_vm0, %v647_v1 }
  0x35 PF: > { %vm655_vm1 = vcmask 261120   ;;  %v2547_v16 = vld [vmem:[%s2842_s24 + $0x8] sm:$0xff]   ;;  %v2690_v17 = vmov 0.0   ;;  %vm2691_vm2 = vmmov 0   ;;  %v2548_v18 = vld [vmem:[%s2842_s24] sm:$0xff]   ;;  %s3212_s17 = scalar_lea.vmem %s3184_s1, %s2824_s22  ;;  %s3213_s21 = scalar_lea.vmem %s3185_s2, %s2824_s22  ;;  %vm789_vm3 = vcmask 64512  }
  0x36   : > { %2331 = vmatprep.subr.bf16.mxu0 %v2690_v17  ;;  %2335 = vmatprep.mubr.msk.bf16.mxu0 %vm2691_vm2, %v2690_v17  ;;  %v2224_v27 = vld [vmem:[%s3212_s17] ss:$0 sm:$0xff]  ;;  %s3214_s28 = scalar_lea.vmem %s3187_s4, %s2824_s22  ;;  %s2692_s26 = smov 96   ;;  %v771_v53 = vlaneseq  ;;  %vm918_vm7 = vcmask 1043456   ;;  %vm1702_vm8 = vcmask 130048   ;;  %vm1705_vm9 = vcmask 195584  }
  0x37   : > { %2332 = vmatpush3.bf16.msra.mxu0 %v2547_v16  ;;  %2351 = vmatprep.subr.bf16.mxu1 %v2690_v17  ;;  %v2225_v31 = vld [vmem:[%s3213_s21] ss:$0 sm:$0xff]  ;;  %s2693_s30 = smov 64   ;;  %s2694_s16 = smov 88  }
  0x38   : > { %2333 = vmatprep.subr.bf16.mxu0 %v2690_v17  ;;  %2353 = vmatprep.mubr.msk.bf16.mxu1 %vm2691_vm2, %v2690_v17  ;;  %v2226_v36 = vld [vmem:[%s3214_s28] ss:$0 sm:$0xff]  ;;  %v772_v54 = vshrl.u32 %v771_v53, 7  ;;  %v774_v55 = vand.u32 127, %v771_v53  ;;  %s2695_s15 = smov 120   ;;  %s2696_s25 = smov 56  }
  0x39   : > { %s2697_s27 = smov 80   ;;  %s2698_s17 = smov 112  }
  0x3a   : > { %vm775_vm4 = vcmp.gt.s32.totalorder %v774_v55, %v772_v54  ;;  %vm776_vm5 = vcmp.ge.s32.totalorder %v774_v55, 8  ;;  %s2699_s24 = smov 48   ;;  %s2700_s19 = smov 72  }
  0x3b   : > { %v2881_v2 = vld [vmem:[#allocation5] sm:$0xff]  ;;  %v2883_v3 = vld [vmem:[#allocation5 + $0x8] sm:$0xff]  ;;  %2334 = vmatpush3.bf16.msra.mxu0 %v2548_v18  ;;  %vm2943_vm6 = vmor %vm775_vm4, %vm776_vm5  ;;  %s2701_s21 = smov 104   ;;  %s2702_s23 = smov 40  }
  0x3c   : > { %v656_v4 = vsel %vm655_vm1, %v2881_v2, 0.0  ;;  %v659_v5 = vsel %vm655_vm1, %v2883_v3, 0.0  ;;  %2339 = vmatprep.subr.bf16.mxu0 %v2690_v17  ;;  %s2703_s0 = smov 8   ;;  %s2704_s28 = smov 16  }
  0x3d   : > { %657 = vadd.xlane.f32.xlu0 %v656_v4 }
  0x41   : > { %660 = vadd.xlane.f32.xlu0 %v659_v5 }
  0xc6   : > { %v658_v6 = vpop.xlane.xlu0 %657 }
  0xc7   : > { %v663_v7 = vmul.f32 0.03125, %v658_v6 }
  0xc9   : > { %v665_v8 = vsub.f32 %v2881_v2, %v663_v7 }
  0xca   : > { %v661_v9 = vpop.xlane.xlu0 %660 }
  0xcb   : > { %v664_v10 = vmul.f32 0.03125, %v661_v9  ;;  %v667_v11 = vmul.f32 %v665_v8, %v665_v8 }
  0xcd   : > { %v666_v12 = vsub.f32 %v2883_v3, %v664_v10  ;;  %v669_v13 = vsel %vm655_vm1, %v667_v11, 0.0 }
  0xce   : > { %670 = vadd.xlane.f32.xlu1 %v669_v13 }
  0xcf   : > { %v668_v14 = vmul.f32 %v666_v12, %v666_v12 }
  0xd1   : > { %v672_v15 = vsel %vm655_vm1, %v668_v14, 0.0 }
  0xd2   : > { %673 = vadd.xlane.f32.xlu1 %v672_v15 }
 0x157   : > { %v671_v19 = vpop.xlane.xlu1 %670 }
 0x158   : > { %v675_v20 = vmul.f32 0.03125, %v671_v19 }
 0x15a   : > { %v677_v21 = vadd.f32 1e-05, %v675_v20 }
 0x15b   : > { %v674_v22 = vpop.xlane.xlu1 %673 }
 0x15c   : > { %2561 = vrsqrt.f32 %v677_v21  ;;  %v676_v23 = vmul.f32 0.03125, %v674_v22 }
 0x15e   : > { %v678_v24 = vadd.f32 1e-05, %v676_v23 }
 0x160   : > { %2563 = vrsqrt.f32 %v678_v24 }
 0x169   : > { %v2562_v25 = vpop.eup %2561 }
 0x16a   : > { %v681_v26 = vmul.f32 %v2562_v25, %v665_v8 }
 0x16c   : > { %v689_v30 = vmul.f32 %v2224_v27, %v681_v26 }
 0x16d   : > { %v2564_v28 = vpop.eup %2563 }
 0x16e   : > { %v682_v29 = vmul.f32 %v2564_v28, %v666_v12  ;;  %v697_v33 = vadd.f32 %v2225_v31, %v689_v30 }
 0x170   : > { %v690_v32 = vmul.f32 %v2224_v27, %v682_v29 }
 0x172   : > { %v698_v34 = vadd.f32 %v2225_v31, %v690_v32 }
 0x174   : > { %v699_v35 = vpack.c.bf16 %v698_v34, %v697_v33 }
 0x176   : > { %2336 = vmatmul.mubr.msk.bf16.vlgmr.msra.gmra.mxu0 %vm655_vm1, %v699_v35 }
 0x177   : > { %2341 = vmatprep.mubr.msk.bf16.mxu0 %vm2691_vm2, %v2690_v17 }
 0x236   : > { %v760_v37 = vpop.f32.mrf.mxu0 }
 0x237   : > { %v761_v38 = vadd.f32 %v2226_v36, %v760_v37 }
 0x238   : > { %v2337_v39 = vpop.f32.mrf.mxu0 }
 0x239   : > { %v2921_v40 = vpack.c.bf16 %v761_v38, %v761_v38  ;;  %v767_v47 = vmul.f32 0.35355338, %v761_v38 }
 0x23a   : > { %v763_v41 = vpop.f32.mrf.mxu0 }
 0x23b   : > { %v764_v42 = vadd.f32 %v2226_v36, %v763_v41  ;;  %787 = vrot.lane.b32.xlu0 %v2921_v40, %s2692_s26  ;;  %v2929_v49 = vpack.c.bf16 %v767_v47, %v767_v47 }
 0x23c   : > { %v2338_v43 = vpop.f32.mrf.mxu0 }
 0x23d   : > { %v2924_v44 = vpack.c.bf16 %v764_v42, %v764_v42  ;;  %v768_v51 = vmul.f32 0.35355338, %v764_v42 }
 0x23f   : > { %837 = vrot.lane.b32.xlu1 %v2924_v44, %s2692_s26  ;;  %v2937_v52 = vpack.c.bf16 %v768_v51, %v768_v51  ;;  %s2705_s26 = smov 24  }
 0x2ad   : > { %v788_v45 = vpop.permute.xlu0 %787 }
 0x2ae   : > { %v794_v46 = vsel %vm789_vm3, %v788_v45, 0 }
 0x2af   : > { %2340 = vmatpush3.bf16.xpose.msra.mxu0 %v794_v46 }
 0x2b0   : > { %2345 = vmatprep.subr.bf16.mxu0 %v2690_v17 }
 0x2b1   : > { %v838_v48 = vpop.permute.xlu1 %837 }
 0x2b2   : > { %v843_v50 = vsel %vm789_vm3, %v838_v48, 0 }
 0x2b6   : > { %2342 = vmatmul.mubr.msk.bf16.vlgmr.msra.gmra.mxu0 %vm789_vm3, %v2929_v49 }
 0x2b7   : > { %2346 = vmatpush3.bf16.xpose.msra.mxu0 %v843_v50  ;;  %2347 = vmatprep.mubr.msk.bf16.mxu0 %vm2691_vm2, %v2690_v17 }
 0x2b8   : > { %2357 = vmatprep.subr.bf16.mxu0 %v2690_v17 }
 0x2be   : > { %2348 = vmatmul.mubr.msk.bf16.vlgmr.msra.gmra.mxu0 %vm789_vm3, %v2937_v52 }
 0x2bf   : > { %2359 = vmatprep.mubr.msk.bf16.mxu0 %vm2691_vm2, %v2690_v17 }
 0x376   : > { %v830_v57 = vpop.f32.mrf.mxu0 }
 0x377   : > { %v887_v58 = vsel %vm2943_vm6, -1e+30, %v830_v57 }
 0x378   : > { %v2343_v59 = vpop.f32.mrf.mxu0  ;;  %v889_v60 = vsel %vm789_vm3, %v887_v58, -inf }
 0x379   : > { %890 = vmax.xlane.f32.xlu1 %v889_v60 }
 0x37a   : > { %v833_v61 = vpop.f32.mrf.mxu0 }
 0x37c   : > { %v2344_v62 = vpop.f32.mrf.mxu0 }
 0x37e   : > { %v879_v63 = vpop.f32.mrf.mxu0 }
 0x37f   : > { %v888_v0 = vsel %vm2943_vm6, -1e+30, %v879_v63 }
 0x380   : > { %v2349_v1 = vpop.f32.mrf.mxu0  ;;  %v892_v4 = vsel %vm789_vm3, %v888_v0, -inf }
 0x381   : > { %893 = vmax.xlane.f32.xlu0 %v892_v4 }
 0x382   : > { %v882_v5 = vpop.f32.mrf.mxu0 }
 0x384   : > { %v2350_v6 = vpop.f32.mrf.mxu0 }
 0x38a   : > { %962 = vrot.lane.b32.xlu1 %v2924_v44, %s2693_s30 }
 0x38e   : > { %1012 = vrot.lane.b32.xlu1 %v2921_v40, %s2694_s16 }
 0x402   : > { %v891_v7 = vpop.xlane.xlu1 %890 }
 0x403   : > { %v895_v8 = vsub.f32 %v887_v58, %v891_v7 }
 0x405   : > { %v897_v9 = vmul.f32 1.442695, %v895_v8 }
 0x406   : > { %v963_v10 = vpop.permute.xlu1 %962 }
 0x407   : > { %2565 = vpow2.f32 %v897_v9  ;;  %v968_v11 = vsel %vm918_vm7, %v963_v10, 0 }
 0x408   : > { %2358 = vmatpush3.bf16.msra.mxu0 %v968_v11 }
 0x409   : > { %2369 = vmatprep.subr.bf16.mxu0 %v2690_v17 }
 0x40a   : > { %v894_v12 = vpop.xlane.xlu0 %893  ;;  %v1013_v21 = vpop.permute.xlu1 %1012 }
 0x40b   : > { %v896_v13 = vsub.f32 %v888_v0, %v894_v12  ;;  %v1018_v28 = vsel %vm789_vm3, %v1013_v21, 0 }
 0x40d   : > { %v899_v14 = vmul.f32 1.442695, %v896_v13 }
 0x40f   : > { %2567 = vpow2.f32 %v899_v14 }
 0x414   : > { %v2566_v15 = vpop.eup %2565 }
 0x415   : > { %v901_v16 = vsel %vm789_vm3, %v2566_v15, 0.0 }
 0x416   : > { %902 = vadd.xlane.f32.xlu0 %v901_v16 }
 0x41c   : > { %v2568_v18 = vpop.eup %2567 }
 0x41d   : > { %v904_v19 = vsel %vm789_vm3, %v2568_v18, 0.0 }
 0x41e   : > { %905 = vadd.xlane.f32.xlu1 %v904_v19 }
 0x42c   : > { %913 = vrot.lane.b32.xlu0 %v2921_v40, %s2693_s30 }
 0x42f   : > { %1062 = vrot.lane.b32.xlu1 %v2924_v44, %s2694_s16  ;;  %s3217_s16 = scalar_lea.vmem %s3189_s6, %s2824_s22 }
 0x430   : > { %1010 = vrot.lane.b32.xlu0 %v2929_v49, %s2695_s15 }
 0x433   : > { %1060 = vrot.lane.b32.xlu1 %v2937_v52, %s2695_s15 }
 0x49f   : > { %v903_v20 = vpop.xlane.xlu0 %902 }
 0x4a0   : > { %2569 = vrcp.f32 %v903_v20 }
 0x4a3   : > { %v914_v22 = vpop.permute.xlu0 %913 }
 0x4a4   : > { %v920_v23 = vsel %vm918_vm7, %v914_v22, 0 }
 0x4a5   : > { %2352 = vmatpush3.bf16.msra.mxu1 %v920_v23 }
 0x4a6   : > { %2363 = vmatprep.subr.bf16.mxu1 %v2690_v17 }
 0x4a7   : > { %v906_v24 = vpop.xlane.xlu1 %905  ;;  %v1011_v33 = vpop.permute.xlu0 %1010 }
 0x4a8   : > { %2571 = vrcp.f32 %v906_v24 }
 0x4ab   : > { %v1063_v31 = vpop.permute.xlu1 %1062 }
 0x4ac   : > { %v1068_v34 = vsel %vm789_vm3, %v1063_v31, 0 }
 0x4ad   : > { %v2570_v25 = vpop.eup %2569 }
 0x4ae   : > { %v909_v26 = vmul.f32 %v2570_v25, %v2566_v15 }
 0x4af   : > { %v1061_v35 = vpop.permute.xlu1 %1060 }
 0x4b0   : > { %v911_v27 = vpack.c.bf16 %v909_v26, %v909_v26 }
 0x4b2   : > { %2354 = vmatmul.mubr.msk.bf16.vlgmr.msra.gmra.mxu1 %vm789_vm3, %v911_v27 }
 0x4b3   : > { %2364 = vmatpush3.bf16.xpose.msra.mxu1 %v1018_v28  ;;  %2365 = vmatprep.mubr.msk.bf16.mxu1 %vm2691_vm2, %v2690_v17 }
 0x4b4   : > { %2375 = vmatprep.subr.bf16.mxu1 %v2690_v17 }
 0x4b5   : > { %v2572_v29 = vpop.eup %2571 }
 0x4b6   : > { %v910_v30 = vmul.f32 %v2572_v29, %v2568_v18 }
 0x4b8   : > { %v912_v32 = vpack.c.bf16 %v910_v30, %v910_v30 }
 0x4ba   : > { %2360 = vmatmul.mubr.msk.bf16.vlgmr.msra.gmra.mxu0 %vm789_vm3, %v912_v32  ;;  %2366 = vmatmul.mubr.msk.bf16.vlgmr.msra.gmra.mxu1 %vm789_vm3, %v1011_v33 }
 0x4bb   : > { %2370 = vmatpush3.bf16.xpose.msra.mxu0 %v1068_v34  ;;  %2371 = vmatprep.mubr.msk.bf16.mxu0 %vm2691_vm2, %v2690_v17 }
 0x4bc   : > { %2381 = vmatprep.subr.bf16.mxu0 %v2690_v17  ;;  %2377 = vmatprep.mubr.msk.bf16.mxu1 %vm2691_vm2, %v2690_v17 }
 0x4c2   : > { %2372 = vmatmul.mubr.msk.bf16.vlgmr.msra.gmra.mxu0 %vm789_vm3, %v1061_v35 }
 0x4c3   : > { %2383 = vmatprep.mubr.msk.bf16.mxu0 %vm2691_vm2, %v2690_v17 }
 0x572   : > { %v2981_v36 = vpop.f32.mrf.mxu1 }
 0x574   : > { %v2355_v37 = vpop.f32.mrf.mxu1 }
 0x576   : > { %v959_v38 = vpop.f32.mrf.mxu1 }
 0x578   : > { %v2356_v39 = vpop.f32.mrf.mxu1 }
 0x57a   : > { %v2983_v41 = vpop.f32.mrf.mxu0  ;;  %v1054_v42 = vpop.f32.mrf.mxu1 }
 0x57b   : > { %v1110_v43 = vsel %vm2943_vm6, -1e+30, %v1054_v42 }
 0x57c   : > { %v2361_v45 = vpop.f32.mrf.mxu0  ;;  %v2367_v46 = vpop.f32.mrf.mxu1  ;;  %v1112_v47 = vsel %vm789_vm3, %v1110_v43, -inf }
 0x57d   : > { %1113 = vmax.xlane.f32.xlu0 %v1112_v47 }
 0x57e   : > { %v1007_v48 = vpop.f32.mrf.mxu0  ;;  %v1057_v50 = vpop.f32.mrf.mxu1 }
 0x580   : > { %v2362_v51 = vpop.f32.mrf.mxu0  ;;  %v2368_v53 = vpop.f32.mrf.mxu1 }
 0x582   : > { %v1104_v54 = vpop.f32.mrf.mxu0 }
 0x583   : > { %v1111_v55 = vsel %vm2943_vm6, -1e+30, %v1104_v54 }
 0x584   : > { %v2373_v57 = vpop.f32.mrf.mxu0  ;;  %v1115_v58 = vsel %vm789_vm3, %v1111_v55, -inf }
 0x585   : > { %1116 = vmax.xlane.f32.xlu1 %v1115_v58 }
 0x586   : > { %v1107_v59 = vpop.f32.mrf.mxu0 }
 0x588   : > { %v2374_v60 = vpop.f32.mrf.mxu0 }
 0x596   : > { %1184 = vrot.lane.b32.xlu1 %v2924_v44, %s2696_s25 }
 0x59a   : > { %1234 = vrot.lane.b32.xlu1 %v2921_v40, %s2697_s27 }
 0x59e   : > { %1284 = vrot.lane.b32.xlu1 %v2924_v44, %s2697_s27 }
 0x5a2   : > { %1282 = vrot.lane.b32.xlu1 %v2937_v52, %s2698_s17 }
 0x606   : > { %v1114_v61 = vpop.xlane.xlu0 %1113 }
 0x607   : > { %v1118_v62 = vsub.f32 %v1110_v43, %v1114_v61 }
 0x609   : > { %v1120_v63 = vmul.f32 1.442695, %v1118_v62 }
 0x60b   : > { %2573 = vpow2.f32 %v1120_v63 }
 0x60e   : > { %v1117_v0 = vpop.xlane.xlu1 %1116 }
 0x60f   : > { %v1119_v1 = vsub.f32 %v1111_v55, %v1117_v0 }
 0x611   : > { %v1122_v4 = vmul.f32 1.442695, %v1119_v1 }
 0x612   : > { %v1185_v5 = vpop.permute.xlu1 %1184 }
 0x613   : > { %2575 = vpow2.f32 %v1122_v4  ;;  %v1190_v6 = vsel %vm918_vm7, %v1185_v5, 0 }
 0x614   : > { %2382 = vmatpush3.bf16.msra.mxu0 %v1190_v6 }
 0x615   : > { %2393 = vmatprep.subr.bf16.mxu0 %v2690_v17 }
 0x616   : > { %v1235_v18 = vpop.permute.xlu1 %1234 }
 0x617   : > { %v1240_v20 = vsel %vm789_vm3, %v1235_v18, 0 }
 0x618   : > { %v2574_v7 = vpop.eup %2573 }
 0x619   : > { %v1124_v8 = vsel %vm789_vm3, %v2574_v7, 0.0 }
 0x61a   : > { %1125 = vadd.xlane.f32.xlu0 %v1124_v8  ;;  %v1285_v23 = vpop.permute.xlu1 %1284 }
 0x61b   : > { %v1290_v26 = vsel %vm789_vm3, %v1285_v23, 0 }
 0x61e   : > { %v1283_v27 = vpop.permute.xlu1 %1282 }
 0x620   : > { %v2576_v9 = vpop.eup %2575 }
 0x621   : > { %v1127_v10 = vsel %vm789_vm3, %v2576_v9, 0.0 }
 0x622   : > { %1128 = vadd.xlane.f32.xlu0 %v1127_v10 }
 0x638   : > { %1136 = vrot.lane.b32.xlu0 %v2921_v40, %s2696_s25 }
 0x63c   : > { %1232 = vrot.lane.b32.xlu0 %v2929_v49, %s2698_s17 }
 0x6a3   : > { %v1126_v11 = vpop.xlane.xlu0 %1125 }
 0x6a4   : > { %2577 = vrcp.f32 %v1126_v11 }
 0x6ab   : > { %v1129_v12 = vpop.xlane.xlu0 %1128 }
 0x6ac   : > { %2579 = vrcp.f32 %v1129_v12 }
 0x6af   : > { %v1137_v13 = vpop.permute.xlu0 %1136 }
 0x6b0   : > { %v1142_v14 = vsel %vm918_vm7, %v1137_v13, 0 }
 0x6b1   : > { %v2578_v15 = vpop.eup %2577  ;;  %2376 = vmatpush3.bf16.msra.mxu1 %v1142_v14 }
 0x6b2   : > { %2387 = vmatprep.subr.bf16.mxu1 %v2690_v17  ;;  %v1132_v16 = vmul.f32 %v2578_v15, %v2574_v7 }
 0x6b3   : > { %v1233_v25 = vpop.permute.xlu0 %1232 }
 0x6b4   : > { %v1134_v19 = vpack.c.bf16 %v1132_v16, %v1132_v16 }
 0x6b6   : > { %2378 = vmatmul.mubr.msk.bf16.vlgmr.msra.gmra.mxu1 %vm789_vm3, %v1134_v19 }
 0x6b7   : > { %2388 = vmatpush3.bf16.xpose.msra.mxu1 %v1240_v20  ;;  %2389 = vmatprep.mubr.msk.bf16.mxu1 %vm2691_vm2, %v2690_v17 }
 0x6b8   : > { %2399 = vmatprep.subr.bf16.mxu1 %v2690_v17 }
 0x6b9   : > { %v2580_v21 = vpop.eup %2579 }
 0x6ba   : > { %v1133_v22 = vmul.f32 %v2580_v21, %v2576_v9 }
 0x6bc   : > { %v1135_v24 = vpack.c.bf16 %v1133_v22, %v1133_v22 }
 0x6be   : > { %2384 = vmatmul.mubr.msk.bf16.vlgmr.msra.gmra.mxu0 %vm789_vm3, %v1135_v24  ;;  %2390 = vmatmul.mubr.msk.bf16.vlgmr.msra.gmra.mxu1 %vm789_vm3, %v1233_v25 }
 0x6bf   : > { %2394 = vmatpush3.bf16.xpose.msra.mxu0 %v1290_v26  ;;  %2395 = vmatprep.mubr.msk.bf16.mxu0 %vm2691_vm2, %v2690_v17 }
 0x6c0   : > { %2405 = vmatprep.subr.bf16.mxu0 %v2690_v17  ;;  %2401 = vmatprep.mubr.msk.bf16.mxu1 %vm2691_vm2, %v2690_v17 }
 0x6c6   : > { %2396 = vmatmul.mubr.msk.bf16.vlgmr.msra.gmra.mxu0 %vm789_vm3, %v1283_v27 }
 0x6c7   : > { %2407 = vmatprep.mubr.msk.bf16.mxu0 %vm2691_vm2, %v2690_v17 }
 0x776   : > { %v3019_v28 = vpop.f32.mrf.mxu1 }
 0x778   : > { %v2379_v29 = vpop.f32.mrf.mxu1 }
 0x77a   : > { %v1181_v30 = vpop.f32.mrf.mxu1 }
 0x77c   : > { %v2380_v31 = vpop.f32.mrf.mxu1 }
 0x77e   : > { %v3021_v32 = vpop.f32.mrf.mxu0  ;;  %v1276_v33 = vpop.f32.mrf.mxu1 }
 0x77f   : > { %v2532_v34 = vpack.i.bf16 %v3021_v32, %v3019_v28  ;;  %v1332_v35 = vsel %vm2943_vm6, -1e+30, %v1276_v33 }
 0x780   : > { %v2385_v37 = vpop.f32.mrf.mxu0  ;;  %v2391_v38 = vpop.f32.mrf.mxu1  ;;  %v1334_v39 = vsel %vm789_vm3, %v1332_v35, -inf }
 0x781   : > { %1335 = vmax.xlane.f32.xlu0 %v1334_v39 }
 0x782   : > { %v1229_v42 = vpop.f32.mrf.mxu0  ;;  %v1279_v43 = vpop.f32.mrf.mxu1 }
 0x784   : > { %v2386_v45 = vpop.f32.mrf.mxu0  ;;  %v2392_v46 = vpop.f32.mrf.mxu1 }
 0x786   : > { %v1326_v47 = vpop.f32.mrf.mxu0 }
 0x787   : > { %v1333_v48 = vsel %vm2943_vm6, -1e+30, %v1326_v47 }
 0x788   : > { %v2397_v50 = vpop.f32.mrf.mxu0  ;;  %v1337_v51 = vsel %vm789_vm3, %v1333_v48, -inf }
 0x789   : > { %1338 = vmax.xlane.f32.xlu1 %v1337_v51 }
 0x78a   : > { %v1329_v53 = vpop.f32.mrf.mxu0 }
 0x78c   : > { %v2398_v54 = vpop.f32.mrf.mxu0 }
 0x79a   : > { %1406 = vrot.lane.b32.xlu1 %v2924_v44, %s2699_s24 }
 0x79e   : > { %1456 = vrot.lane.b32.xlu1 %v2921_v40, %s2700_s19 }
 0x7a2   : > { %1506 = vrot.lane.b32.xlu1 %v2924_v44, %s2700_s19 }
 0x7a6   : > { %1504 = vrot.lane.b32.xlu1 %v2937_v52, %s2701_s21 }
 0x80a   : > { %v1336_v55 = vpop.xlane.xlu0 %1335 }
 0x80b   : > { %v1340_v57 = vsub.f32 %v1332_v35, %v1336_v55 }
 0x80d   : > { %v1342_v58 = vmul.f32 1.442695, %v1340_v57 }
 0x80f   : > { %2581 = vpow2.f32 %v1342_v58 }
 0x812   : > { %v1339_v59 = vpop.xlane.xlu1 %1338 }
 0x813   : > { %v1341_v60 = vsub.f32 %v1333_v48, %v1339_v59 }
 0x815   : > { %v1344_v61 = vmul.f32 1.442695, %v1341_v60 }
 0x816   : > { %v1407_v62 = vpop.permute.xlu1 %1406 }
 0x817   : > { %2583 = vpow2.f32 %v1344_v61  ;;  %v1412_v63 = vsel %vm918_vm7, %v1407_v62, 0 }
 0x818   : > { %2406 = vmatpush3.bf16.msra.mxu0 %v1412_v63 }
 0x819   : > { %2417 = vmatprep.subr.bf16.mxu0 %v2690_v17 }
 0x81a   : > { %v1457_v11 = vpop.permute.xlu1 %1456 }
 0x81b   : > { %v1462_v13 = vsel %vm789_vm3, %v1457_v11, 0 }
 0x81c   : > { %v2582_v0 = vpop.eup %2581 }
 0x81d   : > { %v1346_v1 = vsel %vm789_vm3, %v2582_v0, 0.0 }
 0x81e   : > { %1347 = vadd.xlane.f32.xlu0 %v1346_v1  ;;  %v1507_v15 = vpop.permute.xlu1 %1506 }
 0x81f   : > { %v1512_v19 = vsel %vm789_vm3, %v1507_v15, 0 }
 0x822   : > { %v1505_v20 = vpop.permute.xlu1 %1504 }
 0x824   : > { %v2584_v4 = vpop.eup %2583 }
 0x825   : > { %v1349_v52 = vsel %vm789_vm3, %v2584_v4, 0.0 }
 0x826   : > { %1350 = vadd.xlane.f32.xlu0 %v1349_v52 }
 0x83c   : > { %1358 = vrot.lane.b32.xlu0 %v2921_v40, %s2699_s24  ;;  %s2706_s24 = smov [#allocation5]  }
 0x83d   : > { %s2034_s19 = sshll.u32 %s2706_s24, 4  ;;  %s2035_s19 = int_to_ptr.vmem [resolvable:$true] %s2034_s19 }
 0x83e   : > { %s2631_s22 = scalar_lea.vmem %s2035_s19, 256  ;;  %p2638_p7 = scmp.lt.s32.totalorder %s2035_s19, %s2035_s19 }
 0x83f   : > { %p2632_p4 = scmp.ne.s32.totalorder %s2035_s19, %s2631_s22  ;;  %p2639_p8 = scmp.lt.s32.totalorder %s2631_s22, %s2631_s22 }
 0x840   : > { %1454 = vrot.lane.b32.xlu0 %v2929_v49, %s2701_s21 }
 0x841   : > { %p2640_p9 = por %p2639_p8, %p2638_p7 }
 0x8a7   : > { %v1348_v5 = vpop.xlane.xlu0 %1347 }
 0x8a8   : > { %2585 = vrcp.f32 %v1348_v5  ;;  %v2549_v5 = vld [vmem:[%s2847_s29 + $0x8] sm:$0xff]  }
 0x8af   : > { %v1351_v6 = vpop.xlane.xlu0 %1350 }
 0x8b0   : > { %2587 = vrcp.f32 %v1351_v6  ;;  %v2550_v6 = vld [vmem:[%s2847_s29] sm:$0xff]  }
 0x8b3   : > { %v1359_v7 = vpop.permute.xlu0 %1358 }
 0x8b4   : > { %v1364_v8 = vsel %vm918_vm7, %v1359_v7, 0 }
 0x8b5   : > { %v2586_v9 = vpop.eup %2585  ;;  %2400 = vmatpush3.bf16.msra.mxu1 %v1364_v8 }
 0x8b6   : > { %2411 = vmatprep.subr.bf16.mxu1 %v2690_v17  ;;  %v1354_v10 = vmul.f32 %v2586_v9, %v2582_v0 }
 0x8b7   : > { %v1455_v18 = vpop.permute.xlu0 %1454 }
 0x8b8   : > { %v1356_v12 = vpack.c.bf16 %v1354_v10, %v1354_v10 }
 0x8ba   : > { %2402 = vmatmul.mubr.msk.bf16.vlgmr.msra.gmra.mxu1 %vm789_vm3, %v1356_v12 }
 0x8bb   : > { %2412 = vmatpush3.bf16.xpose.msra.mxu1 %v1462_v13  ;;  %2413 = vmatprep.mubr.msk.bf16.mxu1 %vm2691_vm2, %v2690_v17 }
 0x8bc   : > { %2423 = vmatprep.subr.bf16.mxu1 %v2690_v17 }
 0x8bd   : > { %v2588_v49 = vpop.eup %2587 }
 0x8be   : > { %v1355_v14 = vmul.f32 %v2588_v49, %v2584_v4 }
 0x8c0   : > { %v1357_v16 = vpack.c.bf16 %v1355_v14, %v1355_v14 }
 0x8c2   : > { %2408 = vmatmul.mubr.msk.bf16.vlgmr.msra.gmra.mxu0 %vm789_vm3, %v1357_v16  ;;  %2414 = vmatmul.mubr.msk.bf16.vlgmr.msra.gmra.mxu1 %vm789_vm3, %v1455_v18 }
 0x8c3   : > { %2418 = vmatpush3.bf16.xpose.msra.mxu0 %v1512_v19  ;;  %2419 = vmatprep.mubr.msk.bf16.mxu0 %vm2691_vm2, %v2690_v17 }
 0x8c4   : > { %2429 = vmatprep.subr.bf16.mxu0 %v2690_v17  ;;  %2425 = vmatprep.mubr.msk.bf16.mxu1 %vm2691_vm2, %v2690_v17 }
 0x8ca   : > { %2420 = vmatmul.mubr.msk.bf16.vlgmr.msra.gmra.mxu0 %vm789_vm3, %v1505_v20 }
 0x8cb   : > { %2431 = vmatprep.mubr.msk.bf16.mxu0 %vm2691_vm2, %v2690_v17 }
 0x97a   : > { %v1400_v21 = vpop.f32.mrf.mxu1 }
 0x97c   : > { %v2403_v22 = vpop.f32.mrf.mxu1 }
 0x97e   : > { %v1403_v23 = vpop.f32.mrf.mxu1 }
 0x980   : > { %v2404_v24 = vpop.f32.mrf.mxu1 }
 0x982   : > { %v1448_v25 = vpop.f32.mrf.mxu0  ;;  %v1498_v26 = vpop.f32.mrf.mxu1 }
 0x983   : > { %v1554_v27 = vsel %vm2943_vm6, -1e+30, %v1498_v26  ;;  %v2537_v48 = vpack.i.bf16 %v1448_v25, %v1400_v21 }
 0x984   : > { %v2409_v29 = vpop.f32.mrf.mxu0  ;;  %v2415_v30 = vpop.f32.mrf.mxu1  ;;  %v1556_v31 = vsel %vm789_vm3, %v1554_v27, -inf }
 0x985   : > { %1557 = vmax.xlane.f32.xlu0 %v1556_v31 }
 0x986   : > { %v1451_v33 = vpop.f32.mrf.mxu0  ;;  %v1501_v35 = vpop.f32.mrf.mxu1 }
 0x988   : > { %v2410_v37 = vpop.f32.mrf.mxu0  ;;  %v2416_v38 = vpop.f32.mrf.mxu1 }
 0x98a   : > { %v1548_v39 = vpop.f32.mrf.mxu0 }
 0x98b   : > { %v1555_v42 = vsel %vm2943_vm6, -1e+30, %v1548_v39 }
 0x98c   : > { %v2421_v43 = vpop.f32.mrf.mxu0  ;;  %v1559_v45 = vsel %vm789_vm3, %v1555_v42, -inf }
 0x98d   : > { %1560 = vmax.xlane.f32.xlu1 %v1559_v45 }
 0x98e   : > { %v1551_v46 = vpop.f32.mrf.mxu0 }
 0x990   : > { %v2422_v47 = vpop.f32.mrf.mxu0 }
 0x99e   : > { %1628 = vrot.lane.b32.xlu1 %v2924_v44, %s2702_s23 }
 0x9a2   : > { %2533 = vrot.lane.b32.xlu1 %v2532_v34, %s2703_s0 }
 0x9a6   : > { %2538 = vrot.lane.b32.xlu1 %v2537_v48, %s2704_s28 }
 0xa0e   : > { %v1558_v56 = vpop.xlane.xlu0 %1557 }
 0xa0f   : > { %v1562_v50 = vsub.f32 %v1554_v27, %v1558_v56 }
 0xa11   : > { %v1564_v51 = vmul.f32 1.442695, %v1562_v50 }
 0xa13   : > { %2589 = vpow2.f32 %v1564_v51 }
 0xa16   : > { %v1561_v53 = vpop.xlane.xlu1 %1560 }
 0xa17   : > { %v1563_v54 = vsub.f32 %v1555_v42, %v1561_v53 }
 0xa19   : > { %v1566_v55 = vmul.f32 1.442695, %v1563_v54 }
 0xa1a   : > { %v1629_v57 = vpop.permute.xlu1 %1628 }
 0xa1b   : > { %2591 = vpow2.f32 %v1566_v55  ;;  %v1634_v44 = vsel %vm918_vm7, %v1629_v57, 0 }
 0xa1c   : > { %2430 = vmatpush3.bf16.msra.mxu0 %v1634_v44  ;;  %v2551_v44 = vld [vmem:[%s2864_s3 + $0x8] sm:$0xff]  }
 0xa1d   : > { %2443 = vmatprep.subr.bf16.mxu0 %v2690_v17 }
 0xa1e   : > { %v2534_v15 = vpop.permute.xlu1 %2533 }
 0xa1f   : > { %v2536_v18 = vunpack.i.h.bf16 %v2534_v15  ;;  %v2535_v19 = vunpack.i.l.bf16 %v2534_v15  ;;  %v2560_v15 = vld [vmem:[%s2874_s14] sm:$0xff]  }
 0xa20   : > { %v2590_v58 = vpop.eup %2589 }
 0xa21   : > { %v1568_v28 = vsel %vm789_vm3, %v2590_v58, 0.0  ;;  %v1701_v23 = vsel %vm789_vm3, %v2983_v41, %v2536_v18  ;;  %v1700_v24 = vsel %vm789_vm3, %v2981_v36, %v2535_v19  ;;  %v2250_v41 = vld [vmem:[%s3217_s16] ss:$0 sm:$0xff] }
 0xa22   : > { %1569 = vadd.xlane.f32.xlu0 %v1568_v28  ;;  %v2539_v16 = vpop.permute.xlu1 %2538 }
 0xa23   : > { %v2541_v20 = vunpack.i.h.bf16 %v2539_v16  ;;  %v2540_v21 = vunpack.i.l.bf16 %v2539_v16  ;;  %v2256_v16 = vld [vmem:[%s631_s5] ss:$0 sm:$0xff]  ;;  %s3218_s5 = sld [smem:[#allocation9_spill]] }
 0xa25   : > { %v1703_v27 = vsel %vm1702_vm8, %v1700_v24, %v2540_v21  ;;  %v1704_v29 = vsel %vm1702_vm8, %v1701_v23, %v2541_v20 }
 0xa28   : > { %v2592_v32 = vpop.eup %2591 }
 0xa29   : > { %v1571_v34 = vsel %vm789_vm3, %v2592_v32, 0.0  ;;  %s3219_s21 = sadd.s32 4294967295, %s3218_s5  }
 0xa2a   : > { %1572 = vadd.xlane.f32.xlu0 %v1571_v34  ;;  %p3156_p3 = scmp.eq.s32.totalorder %s3219_s21, 1 }
 0xa2c   : > { %p2633_p5 = pnand %p2632_p4, %p3156_p3 }
 0xa2e   : > { %p2634_p6 = pneg %p2633_p5 }
 0xa30   : > { %p2641_p10 = pnand %p2640_p9, %p2634_p6 }
 0xa40   : > { %1580 = vrot.lane.b32.xlu0 %v2921_v40, %s2702_s23 }
 0xaab   : > { %v1570_v59 = vpop.xlane.xlu0 %1569 }
 0xaac   : > { %2593 = vrcp.f32 %v1570_v59 }
 0xab3   : > { %v1573_v60 = vpop.xlane.xlu0 %1572 }
 0xab4   : > { %2595 = vrcp.f32 %v1573_v60 }
 0xab7   : > { %v1581_v61 = vpop.permute.xlu0 %1580 }
 0xab8   : > { %v1586_v62 = vsel %vm918_vm7, %v1581_v61, 0 }
 0xab9   : > { %v2594_v63 = vpop.eup %2593  ;;  %2424 = vmatpush3.bf16.msra.mxu1 %v1586_v62 }
 0xaba   : > { %v1576_v0 = vmul.f32 %v2594_v63, %v2590_v58  ;;  %2435 = vmatprep.subr.bf16.mxu1 %v2690_v17  ;;  %v2552_v58 = vld [vmem:[%s2864_s3] sm:$0xff]  }
 0xabc   : > { %v1578_v1 = vpack.c.bf16 %v1576_v0, %v1576_v0  ;;  %v2254_v0 = vld [vmem:[%s620_s13] ss:$0 sm:$0xff] }
 0xabe   : > { %2426 = vmatmul.mubr.msk.bf16.vlgmr.msra.gmra.mxu1 %vm789_vm3, %v1578_v1 }
 0xabf   : > { %2439 = vmatprep.mubr.msk.bf16.mxu1 %vm2691_vm2, %v2690_v17  ;;  %2436 = vmatpush3.bf16.msra.mxu1 %v2549_v5 }
 0xac0   : > { %2437 = vmatprep.subr.bf16.mxu1 %v2690_v17 }
 0xac1   : > { %v2596_v40 = vpop.eup %2595 }
 0xac2   : > { %v1577_v4 = vmul.f32 %v2596_v40, %v2592_v32 }
 0xac3   : > { %2438 = vmatpush3.bf16.msra.mxu1 %v2550_v6 }
 0xac4   : > { %v1579_v52 = vpack.c.bf16 %v1577_v4, %v1577_v4  ;;  %2451 = vmatprep.subr.bf16.mxu1 %v2690_v17 }
 0xac6   : > { %2432 = vmatmul.mubr.msk.bf16.vlgmr.msra.gmra.mxu0 %vm789_vm3, %v1579_v52  ;;  %v2255_v52 = vld [vmem:[%s623_s20] ss:$0 sm:$0xff] }
 0xac7   : > { %2447 = vmatprep.mubr.msk.bf16.mxu0 %vm2691_vm2, %v2690_v17  ;;  %2444 = vmatpush3.bf16.msra.mxu0 %v2551_v44 }
 0xac8   : > { %2445 = vmatprep.subr.bf16.mxu0 %v2690_v17 }
 0xacb   : > { %2446 = vmatpush3.bf16.msra.mxu0 %v2552_v58 }
 0xb7e   : > { %v1622_v7 = vpop.f32.mrf.mxu1 }
 0xb80   : > { %v2427_v8 = vpop.f32.mrf.mxu1 }
 0xb82   : > { %v1625_v9 = vpop.f32.mrf.mxu1 }
 0xb83   : > { %v2553_v9 = vld [vmem:[%s2874_s14 + $0x38] sm:$0xff]  }
 0xb84   : > { %v2428_v10 = vpop.f32.mrf.mxu1 }
 0xb85   : > { %v2554_v10 = vld [vmem:[%s2874_s14 + $0x30] sm:$0xff]  }
 0xb86   : > { %v1670_v11 = vpop.f32.mrf.mxu0 }
 0xb87   : > { %v2542_v12 = vpack.i.bf16 %v1670_v11, %v1622_v7  ;;  %v2555_v11 = vld [vmem:[%s2874_s14 + $0x28] sm:$0xff]  }
 0xb88   : > { %v2433_v13 = vpop.f32.mrf.mxu0 }
 0xb89   : > { %2543 = vrot.lane.b32.xlu0 %v2542_v12, %s2705_s26  ;;  %v2556_v12 = vld [vmem:[%s2874_s14 + $0x20] sm:$0xff]   ;;  %v2557_v13 = vld [vmem:[%s2874_s14 + $0x18] sm:$0xff]  }
 0xb8a   : > { %v1673_v49 = vpop.f32.mrf.mxu0 }
 0xb8b   : > { %v2558_v49 = vld [vmem:[%s2874_s14 + $0x10] sm:$0xff]  }
 0xb8c   : > { %v2434_v14 = vpop.f32.mrf.mxu0 }
 0xb8d   : > { %v2559_v14 = vld [vmem:[%s2874_s14 + $0x8] sm:$0xff]  }
 0xbfb   : > { %v2544_v22 = vpop.permute.xlu0 %2543 }
 0xbfc   : > { %v2546_v25 = vunpack.i.h.bf16 %v2544_v22  ;;  %v2545_v26 = vunpack.i.l.bf16 %v2544_v22 }
 0xbfe   : > { %v1707_v30 = vsel %vm1705_vm9, %v1704_v29, %v2546_v25  ;;  %v1706_v31 = vsel %vm1705_vm9, %v1703_v27, %v2545_v26 }
 0xbff   : > { %v1708_v33 = vpack.c.bf16 %v1707_v30, %v1706_v31 }
 0xc01   : > { %2440 = vmatmul.mubr.msk.bf16.vlgmr.msra.gmra.mxu1 %vm655_vm1, %v1708_v33 }
 0xc02   : > { %2467 = vmatprep.mubr.msk.bf16.mxu1 %vm2691_vm2, %v2690_v17  ;;  %2452 = vmatpush3.bf16.msra.mxu1 %v2553_v9 }
 0xc03   : > { %2453 = vmatprep.subr.bf16.mxu1 %v2690_v17 }
 0xc06   : > { %2454 = vmatpush3.bf16.msra.mxu1 %v2554_v10 }
 0xc07   : > { %2455 = vmatprep.subr.bf16.mxu1 %v2690_v17 }
 0xc0a   : > { %2456 = vmatpush3.bf16.msra.mxu1 %v2555_v11 }
 0xc0b   : > { %2457 = vmatprep.subr.bf16.mxu1 %v2690_v17 }
 0xc0e   : > { %2458 = vmatpush3.bf16.msra.mxu1 %v2556_v12 }
 0xc0f   : > { %2459 = vmatprep.subr.bf16.mxu1 %v2690_v17 }
 0xc12   : > { %2460 = vmatpush3.bf16.msra.mxu1 %v2557_v13 }
 0xc13   : > { %2461 = vmatprep.subr.bf16.mxu1 %v2690_v17 }
 0xc16   : > { %2462 = vmatpush3.bf16.msra.mxu1 %v2558_v49 }
 0xc17   : > { %2463 = vmatprep.subr.bf16.mxu1 %v2690_v17 }
 0xc1a   : > { %2464 = vmatpush3.bf16.msra.mxu1 %v2559_v14 }
 0xc1b   : > { %2465 = vmatprep.subr.bf16.mxu1 %v2690_v17 }
 0xc1e   : > { %2466 = vmatpush3.bf16.msra.mxu1 %v2560_v15 }
 0xcc1   : > { %v1769_v35 = vpop.f32.mrf.mxu1 }
 0xcc2   : > { %v1770_v37 = vadd.f32 %v2250_v41, %v1769_v35 }
 0xcc3   : > { %v2441_v36 = vpop.f32.mrf.mxu1 }
 0xcc4   : > { %v3100_v38 = vadd.f32 %v1770_v37, %v2881_v2 }
 0xcc5   : > { %v1772_v39 = vpop.f32.mrf.mxu1 }
 0xcc6   : > { %v1773_v42 = vadd.f32 %v2250_v41, %v1772_v39  ;;  %v1780_v43 = vsel %vm655_vm1, %v3100_v38, 0.0 }
 0xcc7   : > { %1781 = vadd.xlane.f32.xlu1 %v1780_v43  ;;  %v2442_v45 = vpop.f32.mrf.mxu1 }
 0xcc8   : > { %v3105_v46 = vadd.f32 %v1773_v42, %v2883_v3 }
 0xcca   : > { %v1783_v47 = vsel %vm655_vm1, %v3105_v46, 0.0 }
 0xccb   : > { %1784 = vadd.xlane.f32.xlu0 %v1783_v47 }
 0xd50   : > { %v1782_v48 = vpop.xlane.xlu1 %1781 }
 0xd51   : > { %v1786_v56 = vmul.f32 0.03125, %v1782_v48 }
 0xd53   : > { %v1788_v2 = vsub.f32 %v3100_v38, %v1786_v56  ;;  %v2260_v56 = vld [vmem:[%s639_s18] ss:$0 sm:$0xff] }
 0xd54   : > { %v1785_v50 = vpop.xlane.xlu0 %1784 }
 0xd55   : > { %v1787_v51 = vmul.f32 0.03125, %v1785_v50  ;;  %v1790_v53 = vmul.f32 %v1788_v2, %v1788_v2 }
 0xd57   : > { %v1789_v54 = vsub.f32 %v3105_v46, %v1787_v51  ;;  %v1792_v55 = vsel %vm655_vm1, %v1790_v53, 0.0 }
 0xd58   : > { %1793 = vadd.xlane.f32.xlu0 %v1792_v55 }
 0xd59   : > { %v1791_v57 = vmul.f32 %v1789_v54, %v1789_v54 }
 0xd5b   : > { %v1795_v3 = vsel %vm655_vm1, %v1791_v57, 0.0 }
 0xd5c   : > { %1796 = vadd.xlane.f32.xlu0 %v1795_v3 }
 0xde1   : > { %v1794_v28 = vpop.xlane.xlu0 %1793 }
 0xde2   : > { %v1798_v32 = vmul.f32 0.03125, %v1794_v28 }
 0xde4   : > { %v1800_v34 = vadd.f32 1e-05, %v1798_v32 }
 0xde5   : > { %v1797_v59 = vpop.xlane.xlu0 %1796 }
 0xde6   : > { %2597 = vrsqrt.f32 %v1800_v34  ;;  %v1799_v60 = vmul.f32 0.03125, %v1797_v59 }
 0xde8   : > { %v1801_v61 = vadd.f32 1e-05, %v1799_v60 }
 0xdea   : > { %2599 = vrsqrt.f32 %v1801_v61 }
 0xdf3   : > { %v2598_v62 = vpop.eup %2597 }
 0xdf4   : > { %v1804_v63 = vmul.f32 %v2598_v62, %v1788_v2 }
 0xdf6   : > { %v1812_v4 = vmul.f32 %v2254_v0, %v1804_v63 }
 0xdf7   : > { %v2600_v1 = vpop.eup %2599 }
 0xdf8   : > { %v1805_v40 = vmul.f32 %v2600_v1, %v1789_v54  ;;  %v1820_v6 = vadd.f32 %v2255_v52, %v1812_v4 }
 0xdfa   : > { %v1813_v5 = vmul.f32 %v2254_v0, %v1805_v40 }
 0xdfc   : > { %v1821_v7 = vadd.f32 %v2255_v52, %v1813_v5 }
 0xdfe   : > { %v1822_v8 = vpack.c.bf16 %v1821_v7, %v1820_v6 }
 0xe00   : > { %2448 = vmatmul.mubr.msk.bf16.vlgmr.msra.gmra.mxu0 %vm655_vm1, %v1822_v8 }
 0xec0   : > { %v1883_v18 = vpop.f32.mrf.mxu0 }
 0xec1   : > { %v1884_v19 = vadd.f32 %v2256_v16, %v1883_v18 }
 0xec2   : > { %v2449_v20 = vpop.f32.mrf.mxu0 }
 0xec3   : > { %v1892_v21 = vmul.f32 0.044715, %v1884_v19  ;;  %v1890_v39 = vmul.f32 0.5, %v1884_v19 }
 0xec4   : > { %v1886_v22 = vpop.f32.mrf.mxu0 }
 0xec5   : > { %v1894_v23 = vmul.f32 %v1892_v21, %v1884_v19  ;;  %v1887_v24 = vadd.f32 %v2256_v16, %v1886_v22 }
 0xec6   : > { %v2450_v25 = vpop.f32.mrf.mxu0 }
 0xec7   : > { %v1896_v26 = vmul.f32 %v1894_v23, %v1884_v19  ;;  %v1893_v27 = vmul.f32 0.044715, %v1887_v24  ;;  %v1891_v42 = vmul.f32 0.5, %v1887_v24 }
 0xec9   : > { %v1898_v29 = vadd.f32 %v1896_v26, %v1884_v19  ;;  %v1895_v30 = vmul.f32 %v1893_v27, %v1887_v24 }
 0xecb   : > { %v1900_v31 = vmul.f32 0.7978846, %v1898_v29  ;;  %v1897_v17 = vmul.f32 %v1895_v30, %v1887_v24 }
 0xecd   : > { %2601 = vtanh.f32 %v1900_v31  ;;  %v1899_v33 = vadd.f32 %v1897_v17, %v1887_v24 }
 0xecf   : > { %v1901_v41 = vmul.f32 0.7978846, %v1899_v33 }
 0xed1   : > { %2603 = vtanh.f32 %v1901_v41 }
 0xeda   : > { %v2602_v35 = vpop.eup %2601 }
 0xedb   : > { %v1904_v37 = vadd.f32 1.0, %v2602_v35 }
 0xedd   : > { %v1906_v45 = vmul.f32 %v1904_v37, %v1890_v39 }
 0xede   : > { %v2604_v36 = vpop.eup %2603 }
 0xedf   : > { %v1905_v43 = vadd.f32 1.0, %v2604_v36 }
 0xee1   : > { %v1907_v47 = vmul.f32 %v1905_v43, %v1891_v42 }
 0xee3   : > { %v1908_v48 = vpack.c.bf16 %v1907_v47, %v1906_v45 }
 0xee5   : > { %2468 = vmatmul.mubr.bf16.vlgmr.msra.gmra.mxu1 %v1908_v48 }
 0xfa5   : > { %v2014_v2 = vpop.f32.mrf.mxu1 }
 0xfa6   : > { %v2015_v50 = vadd.f32 %v2260_v56, %v2014_v2 }
 0xfa7   : > { %v2469_v51 = vpop.f32.mrf.mxu1 }
 0xfa8   : > { %v2021_v53 = vadd.f32 %v2015_v50, %v3100_v38 }
 0xfa9   : > { %v2017_v54 = vpop.f32.mrf.mxu1 }
 0xfaa   : > { %2023 = vst.msk [vmem:[#allocation5] sm:$0xff] %vm655_vm1, %v2021_v53  ;;  %v2018_v55 = vadd.f32 %v2260_v56, %v2017_v54 }
 0xfab   : > { %v2470_v57 = vpop.f32.mrf.mxu1 }
 0xfac   : > { %v2022_v3 = vadd.f32 %v2018_v55, %v3105_v46 }
 0xfae   : > { %2024 = vst.msk [vmem:[#allocation5 + $0x8] sm:$0xff] %vm655_vm1, %v2022_v3 }
 0xfaf   : > { %2644 = shalt.err (!%p2641_p10)
}
 0xfb0   : > { %s2707_s18 = smov 128   ;;  %s3221_s29 = sld [smem:[#allocation14_spill]] }
 0xfb6   : > { %2476 = dma.vmem_to_hbm [thread:$0]  (%p3156_p3), %s2035_s19, 256, %s3221_s29, [#allocation4], %s2707_s18, %s2707_s18, %s2703_s0  }
 0xfb7   : > { %2672 = dma.done.wait (%p3156_p3), [#allocation4], 256  }
 0xfb8   : > { %2674 = vsyncadd (%p3156_p3), [#allocation4], 4294967040 }
 0xfb9 PF: > { %s3222_s30 = sld [smem:[#allocation9_spill]] }
 0xfba   : > { %s3223_s25 = sld [smem:[#allocation8_spill]] }
 0xfbb   : > { %s3224_s26 = sld [smem:[#allocation10_spill]] }
 0xfbf   : > { %s25_s27 = sadd.s32 1, %s3222_s30  }
 0xfc0   : > { %p22_p11 = scmp.ge.s32.totalorder %s25_s27, 4  }
 0xfc2   :  { %24 = sbr.rel (!%p22_p11) target bundleno = 8 (0x8), region = 143 }
 0xfc7   :  { %2050 = vsyncpa [#allocation3], 1 }
 0xfc8   :  { %2052 = vsyncpa [#allocation3 + $0x1], 1 }
 0xfc9   :  { %2053 = vsyncpa [#allocation4], 1 }
 0xfca   :  { %2055 = vsyncpa [#allocation4 + $0x1], 1 }

</bundles_post_ra>
